<compile_context>
chip_gen: v7x
topology: tpu7x:2x2x1
jax: 0.10.0
libtpu: 0.0.40
codegen_flags: <defaults>
</compile_context>

<pallas_src>
import functools

import jax
import jax.numpy as jnp
from jax.experimental import pallas as pl
from jax.experimental.pallas import tpu as pltpu


def _cnn_kernel(x_ref, w0_ref, w1_ref, bc_ref, a2_ref, b1_ref, w2_ref, b2_ref,
                out_ref, pool_ref, *, bb, lp_pad, out_dim):
    # x_ref   : (bb, C_in, 4*lp_pad) phase-major tap-0 embeddings; x[b,c,d*lp_pad+j] = emb[b,c,4j+d]
    # w0/w1   : (C_out, C_in)        conv taps W[:, :, 0] / W[:, :, 1]
    # bc      : (C_out, 1)           conv bias
    # a2      : (C_out*lp_pad, H)    fc1 weight, channel-major flatten folded in, zero rows at
    #                                padded pooled positions (j >= l_pool)
    # b1      : (1, H)               fc1 bias
    # w2      : (H, OUT_PAD)         fc2 weight, zero-padded to 128 lane-dense outputs
    # b2      : (1, OUT_PAD)         fc2 bias (zero in padded lanes)
    # out_ref : (bb, OUT_PAD)        softmax probabilities (real classes in [:out_dim])
    # pool_ref: (bb, C_out, lp_pad)  VMEM scratch: pooled+ReLU activations, sample-major
    c_out = w0_ref.shape[0]
    w0 = w0_ref[...]
    w1 = w1_ref[...]
    bc = bc_ref[...]

    # ---- Conv1d(k=2) + MaxPool1d(4) + bias + ReLU, one sample at a time ----
    # ONE (C_out, lp_pad) block store per sample replaces the old C_out*bb single-sublane stores.
    for b in range(bb):
        e0 = x_ref[b]                                             # (C_in, 4*lp_pad), tap 0
        # tap 1: phases 1..3 are the next phase chunks of tap 0; phase 3 is phase 0 shifted by
        # one pooled position (x[4j+4] == phase0[j+1]).  Rebuilt in-kernel from the same data.
        e1 = jnp.concatenate([e0[:, lp_pad:], e0[:, 1:lp_pad + 1]], axis=1)   # (C_in, 4*lp_pad)
        conv = (jnp.dot(w0, e0, preferred_element_type=jnp.float32)
                + jnp.dot(w1, e1, preferred_element_type=jnp.float32))        # (C_out, 4*lp_pad)
        # MaxPool1d(4): elementwise max over the 4 phase chunks.
        m = jnp.maximum(jnp.maximum(conv[:, :lp_pad], conv[:, lp_pad:2 * lp_pad]),
                        jnp.maximum(conv[:, 2 * lp_pad:3 * lp_pad], conv[:, 3 * lp_pad:]))
        # per-channel conv bias commutes with the max; ReLU afterwards.
        pool_ref[b] = jnp.maximum(m + bc, 0.0)                    # (C_out, lp_pad)
    # TODO(synk): nn.Dropout is treated as identity (inference / eval mode).

    # ---- fc1 + ReLU: per-channel (bb, lp_pad) slabs -> lane concat -> ONE MXU matmul ----
    flat = jnp.concatenate([pool_ref[:, o, :] for o in range(c_out)], axis=1)  # (bb, C_out*lp_pad)
    h1 = jnp.dot(flat, a2_ref[...], preferred_element_type=jnp.float32) + b1_ref[...]
    h1 = jnp.maximum(h1, 0.0)                                     # (bb, H)

    # ---- fc2 + ReLU (lane-dense, padded to OUT_PAD outputs) ----
    z = jnp.dot(h1, w2_ref[...], preferred_element_type=jnp.float32) + b2_ref[...]
    z = jnp.maximum(z, 0.0)                                       # (bb, OUT_PAD)

    # ---- softmax over the real classes only: mask padded lanes BEFORE max/exp ----
    lane = jax.lax.broadcasted_iota(jnp.int32, z.shape, 1)
    z = jnp.where(lane < out_dim, z, jnp.float32(-1e30))
    z = z - jnp.max(z, axis=-1, keepdims=True)
    ez = jnp.exp(z)
    inv = pl.reciprocal(jnp.sum(ez, axis=-1, keepdims=True), approx=False)
    out_ref[...] = (ez * inv).astype(out_ref.dtype)


def prepare_params(params, out_pad=128):
    """Token-independent weight / table prep, hoisted out of the per-call path (run once)."""
    embed = params["embed"].astype(jnp.float32)           # (n_vocab, L)
    conv_w = params["conv_w"].astype(jnp.float32)         # (C_out, C_in, 2)
    conv_b = params["conv_b"].astype(jnp.float32)
    fc1_w = params["fc1_w"].astype(jnp.float32)           # (H, C_out*l_pool)
    fc1_b = params["fc1_b"].astype(jnp.float32)
    fc2_w = params["fc2_w"].astype(jnp.float32)           # (OUT, H)
    fc2_b = params["fc2_b"].astype(jnp.float32)

    n_vocab, L = embed.shape
    c_out = conv_w.shape[0]
    hdim, fin = fc1_w.shape
    out_dim = fc2_w.shape[0]
    l_conv = L - 1                      # Conv1d(k=2), no padding
    l_pool = (l_conv - 4) // 4 + 1      # MaxPool1d(4), stride 4
    assert c_out * l_pool == fin, "fc1 in_features must equal C_out * l_pool"
    assert out_dim <= out_pad
    lp_pad = l_pool + 1                 # 63 -> 64: lane-friendly + room for the tap-1 shift

    # Phase-major (stride-4 de-interleaved) tap-0 embedding table:
    #   embed_x[v, d*lp_pad + j] = embed[v, 4j + d]   (zero where 4j+d >= L)
    # The per-call token glue then collapses to a single XLA gather embed_x[tokens].
    d = jnp.arange(4)
    j = jnp.arange(lp_pad)
    pos = (4 * j[None, :] + d[:, None]).reshape(-1)       # (4*lp_pad,) phase-major
    valid = (pos < L).astype(jnp.float32)
    embed_x = embed[:, jnp.minimum(pos, L - 1)] * valid[None, :]   # (n_vocab, 4*lp_pad)

    w0 = conv_w[:, :, 0]                                  # (C_out, C_in)
    w1 = conv_w[:, :, 1]                                  # (C_out, C_in)
    bc = conv_b[:, None]                                  # (C_out, 1)
    # fc1 weight: channel-major flatten folded in; pooled axis zero-padded l_pool -> lp_pad
    # (zero rows cancel whatever relu(conv) produces at the padded pooled positions).
    w1r = jnp.transpose(fc1_w.reshape(hdim, c_out, l_pool), (1, 2, 0))   # (C_out, l_pool, H)
    a2 = jnp.pad(w1r, ((0, 0), (0, lp_pad - l_pool), (0, 0))).reshape(c_out * lp_pad, hdim)
    b1 = fc1_b[None, :]                                   # (1, H)
    w2p = jnp.zeros((hdim, out_pad), jnp.float32).at[:, :out_dim].set(fc2_w.T)
    b2p = jnp.zeros((1, out_pad), jnp.float32).at[:, :out_dim].set(fc2_b[None, :])
    return {"embed_x": embed_x, "w0": w0, "w1": w1, "bc": bc, "a2": a2,
            "b1": b1, "w2p": w2p, "b2p": b2p}


def cnn_forward(tokens, prep, *, out_dim):
    embed_x, w0, w1, bc, a2, b1, w2p, b2p = (prep[k] for k in
        ("embed_x", "w0", "w1", "bc", "a2", "b1", "w2p", "b2p"))

    B, c_in = tokens.shape
    c_out = w0.shape[0]
    hdim = a2.shape[1]
    out_pad = w2p.shape[1]
    lp_pad = embed_x.shape[1] // 4
    assert a2.shape[0] == c_out * lp_pad

    # Batch blocking: bb samples per grid step, always even, capped so the unrolled per-sample
    # conv loop stays small.  Large B -> nb >= 2 grid steps, which ("parallel",) shards across
    # the two v7x TensorCores.  VMEM per step is ~2 MB, far under every generation's limit.
    bb = min(B + (B % 2), 32)
    nb = -(-B // bb)
    b_pad = nb * bb

    # ---- token-dependent glue: ONE gather from the phase-major table ----
    tok = jnp.pad(tokens, ((0, b_pad - B), (0, 0)))        # pad with token 0 (valid row)
    ex = embed_x[tok]                                      # (b_pad, C_in, 4*lp_pad) f32
    # TODO(synk): at tiny B even this single gather could move in-kernel (scalar-prefetched
    # tokens + dynamic row loads) or be fused via CompilerParams(allow_input_fusion=...).

    out = pl.pallas_call(
        functools.partial(_cnn_kernel, bb=bb, lp_pad=lp_pad, out_dim=out_dim),
        out_shape=jax.ShapeDtypeStruct((b_pad, out_pad), jnp.float32),
        grid_spec=pltpu.PrefetchScalarGridSpec(
            num_scalar_prefetch=0,
            grid=(nb,),
            in_specs=[
                pl.BlockSpec((bb, c_in, 4 * lp_pad), lambda i: (i, 0, 0)),
                pl.BlockSpec((c_out, c_in), lambda i: (0, 0)),
                pl.BlockSpec((c_out, c_in), lambda i: (0, 0)),
                pl.BlockSpec((c_out, 1), lambda i: (0, 0)),
                pl.BlockSpec((c_out * lp_pad, hdim), lambda i: (0, 0)),
                pl.BlockSpec((1, hdim), lambda i: (0, 0)),
                pl.BlockSpec((hdim, out_pad), lambda i: (0, 0)),
                pl.BlockSpec((1, out_pad), lambda i: (0, 0)),
            ],
            out_specs=pl.BlockSpec((bb, out_pad), lambda i: (i, 0)),
            scratch_shapes=[pltpu.VMEM((bb, c_out, lp_pad), jnp.float32)],
        ),
        compiler_params=pltpu.CompilerParams(dimension_semantics=("parallel",)),
    )(ex, w0, w1, bc, a2, b1, w2p, b2p)
    return out[:B, :out_dim]


def reference(tokens, p):
    """Pure-JAX replica of the PyTorch forward (eval mode) for sanity checking."""
    emb = p["embed"][tokens].astype(jnp.float32)                 # (B, C, L)
    x0, x1 = emb[:, :, :-1], emb[:, :, 1:]
    conv = (jnp.einsum("oc,bcl->bol", p["conv_w"][:, :, 0], x0)
            + jnp.einsum("oc,bcl->bol", p["conv_w"][:, :, 1], x1)
            + p["conv_b"][None, :, None])                        # (B, C_out, L-1)
    B, C, Lc = conv.shape
    lp = (Lc - 4) // 4 + 1
    pooled = conv[:, :, :4 * lp].reshape(B, C, lp, 4).max(axis=-1)
    h = jax.nn.relu(pooled).reshape(B, -1)
    h = jax.nn.relu(h @ p["fc1_w"].T + p["fc1_b"])
    h = jax.nn.relu(h @ p["fc2_w"].T + p["fc2_b"])
    return jax.nn.softmax(h, axis=-1)


if __name__ == "__main__":
    B = 2
    INPUT_DIM = 20      # seq length == conv in-channels
    OUTPUT_DIM = 4
    N_VOCAB = 100
    EMBED_DIM = 256     # (INPUT_DIM//2) * ((EMBED_DIM-1-4)//4 + 1) == 630 == fc1 in_features

    key = jax.random.PRNGKey(0)
    ks = jax.random.split(key, 8)
    params = {
        "embed": 0.10 * jax.random.normal(ks[0], (N_VOCAB, EMBED_DIM), jnp.float32),
        "conv_w": 0.10 * jax.random.normal(ks[1], (INPUT_DIM // 2, INPUT_DIM, 2), jnp.float32),
        "conv_b": 0.10 * jax.random.normal(ks[2], (INPUT_DIM // 2,), jnp.float32),
        "fc1_w": 0.05 * jax.random.normal(ks[3], (256, 630), jnp.float32),
        "fc1_b": 0.05 * jax.random.normal(ks[4], (256,), jnp.float32),
        "fc2_w": 0.05 * jax.random.normal(ks[5], (OUTPUT_DIM, 256), jnp.float32),
        "fc2_b": 0.05 * jax.random.normal(ks[6], (OUTPUT_DIM,), jnp.float32),
    }
    tokens = jax.random.randint(ks[7], (B, INPUT_DIM), 0, N_VOCAB)

    prep = prepare_params(params)       # hoisted weight/table prep: run once, not per call
    fwd = jax.jit(cnn_forward, static_argnames=("out_dim",))
    out = fwd(tokens, prep, out_dim=OUTPUT_DIM)
    out = jax.block_until_ready(out)

    ref = reference(tokens, params)
    assert out.shape == (B, OUTPUT_DIM)
    if not jnp.allclose(out, ref, atol=1e-4, rtol=1e-4):
        raise AssertionError(f"kernel/reference mismatch:\n{out}\n{ref}")
    print("KERNEL_OK")
</pallas_src>

<mosaic_0001>
module attributes {stable_mosaic.version = 11 : i64} {
  func.func @_cnn_kernel(%arg0: i32, %arg1: memref<2x20x256xf32, #tpu.memory_space<vmem>>, %arg2: memref<10x20xf32, #tpu.memory_space<vmem>>, %arg3: memref<10x20xf32, #tpu.memory_space<vmem>>, %arg4: memref<10x1xf32, #tpu.memory_space<vmem>>, %arg5: memref<640x256xf32, #tpu.memory_space<vmem>>, %arg6: memref<1x256xf32, #tpu.memory_space<vmem>>, %arg7: memref<256x128xf32, #tpu.memory_space<vmem>>, %arg8: memref<1x128xf32, #tpu.memory_space<vmem>>, %arg9: memref<2x128xf32, #tpu.memory_space<vmem>>, %arg10: memref<2x10x64xf32, #tpu.memory_space<vmem>>) attributes {dimension_semantics = [#tpu.dimension_semantics<parallel>], iteration_bounds = array<i64: 1>, scalar_prefetch = 0 : i64, scratch_operands = 1 : i64, tpu.core_type = #tpu.core_type<tc>, window_params = [{transform_indices = @transform_0, window_bounds = array<i64: 2, 20, 256>}, {pipeline_mode = #tpu.pipeline_mode<synchronous>, transform_indices = @transform_1, window_bounds = array<i64: 10, 20>}, {pipeline_mode = #tpu.pipeline_mode<synchronous>, transform_indices = @transform_2, window_bounds = array<i64: 10, 20>}, {pipeline_mode = #tpu.pipeline_mode<synchronous>, transform_indices = @transform_3, window_bounds = array<i64: 10, 1>}, {pipeline_mode = #tpu.pipeline_mode<synchronous>, transform_indices = @transform_4, window_bounds = array<i64: 640, 256>}, {pipeline_mode = #tpu.pipeline_mode<synchronous>, transform_indices = @transform_5, window_bounds = array<i64: 1, 256>}, {pipeline_mode = #tpu.pipeline_mode<synchronous>, transform_indices = @transform_6, window_bounds = array<i64: 256, 128>}, {pipeline_mode = #tpu.pipeline_mode<synchronous>, transform_indices = @transform_7, window_bounds = array<i64: 1, 128>}, {transform_indices = @transform_8, window_bounds = array<i64: 2, 128>}]} {
    %c0 = arith.constant 0 : index
    %c0_0 = arith.constant 0 : index
    %0 = vector.load %arg2[%c0, %c0_0] : memref<10x20xf32, #tpu.memory_space<vmem>>, vector<10x20xf32>
    %c0_1 = arith.constant 0 : index
    %c0_2 = arith.constant 0 : index
    %1 = vector.load %arg3[%c0_1, %c0_2] : memref<10x20xf32, #tpu.memory_space<vmem>>, vector<10x20xf32>
    %c0_3 = arith.constant 0 : index
    %c0_4 = arith.constant 0 : index
    %2 = vector.load %arg4[%c0_3, %c0_4] : memref<10x1xf32, #tpu.memory_space<vmem>>, vector<10x1xf32>
    %c0_5 = arith.constant 0 : index
    %c0_6 = arith.constant 0 : index
    %c0_7 = arith.constant 0 : index
    %3 = vector.load %arg1[%c0_5, %c0_6, %c0_7] : memref<2x20x256xf32, #tpu.memory_space<vmem>>, vector<1x20x256xf32>
    %4 = vector.shape_cast %3 : vector<1x20x256xf32> to vector<20x256xf32>
    %5 = vector.extract_strided_slice %4 {offsets = [0, 64], sizes = [20, 192], strides = [1, 1]} : vector<20x256xf32> to vector<20x192xf32>
    %6 = vector.extract_strided_slice %4 {offsets = [0, 1], sizes = [20, 64], strides = [1, 1]} : vector<20x256xf32> to vector<20x64xf32>
    %7 = tpu.concatenate %5, %6 in 1 : vector<20x192xf32>, vector<20x64xf32> -> vector<20x256xf32>
    %cst = arith.constant dense<0.000000e+00> : vector<10x256xf32>
    %8 = tpu.matmul %0, %4, %cst {dimension_numbers = #tpu.dot_dimension_numbers<[1], [0], [0], [1], [0, 0, 1, 1], [], []>} : vector<10x20xf32>, vector<20x256xf32>, vector<10x256xf32> -> vector<10x256xf32>
    %cst_8 = arith.constant dense<0.000000e+00> : vector<10x256xf32>
    %9 = tpu.matmul %1, %7, %cst_8 {dimension_numbers = #tpu.dot_dimension_numbers<[1], [0], [0], [1], [0, 0, 1, 1], [], []>} : vector<10x20xf32>, vector<20x256xf32>, vector<10x256xf32> -> vector<10x256xf32>
    %10 = arith.addf %8, %9 : vector<10x256xf32>
    %11 = vector.extract_strided_slice %10 {offsets = [0, 0], sizes = [10, 64], strides = [1, 1]} : vector<10x256xf32> to vector<10x64xf32>
    %12 = vector.extract_strided_slice %10 {offsets = [0, 64], sizes = [10, 64], strides = [1, 1]} : vector<10x256xf32> to vector<10x64xf32>
    %13 = arith.maximumf %11, %12 : vector<10x64xf32>
    %14 = vector.extract_strided_slice %10 {offsets = [0, 128], sizes = [10, 64], strides = [1, 1]} : vector<10x256xf32> to vector<10x64xf32>
    %15 = vector.extract_strided_slice %10 {offsets = [0, 192], sizes = [10, 64], strides = [1, 1]} : vector<10x256xf32> to vector<10x64xf32>
    %16 = arith.maximumf %14, %15 : vector<10x64xf32>
    %17 = arith.maximumf %13, %16 : vector<10x64xf32>
    %18 = vector.broadcast %2 : vector<10x1xf32> to vector<10x64xf32>
    %19 = arith.addf %17, %18 : vector<10x64xf32>
    %cst_9 = arith.constant 0.000000e+00 : f32
    %20 = vector.broadcast %cst_9 : f32 to vector<10x64xf32>
    %21 = arith.maximumf %19, %20 : vector<10x64xf32>
    %c0_10 = arith.constant 0 : index
    %c0_11 = arith.constant 0 : index
    %c0_12 = arith.constant 0 : index
    %22 = vector.load %arg10[%c0_10, %c0_11, %c0_12] : memref<2x10x64xf32, #tpu.memory_space<vmem>>, vector<1x10x64xf32>
    %23 = vector.shape_cast %22 : vector<1x10x64xf32> to vector<10x64xf32>
    %24 = vector.shape_cast %21 : vector<10x64xf32> to vector<1x10x64xf32>
    tpu.vector_store %arg10[%c0_10, %c0_11, %c0_12], %24 {strides = array<i32>} : memref<2x10x64xf32, #tpu.memory_space<vmem>>, vector<1x10x64xf32>,
    %c1 = arith.constant 1 : index
    %c0_13 = arith.constant 0 : index
    %c0_14 = arith.constant 0 : index
    %25 = vector.load %arg1[%c1, %c0_13, %c0_14] : memref<2x20x256xf32, #tpu.memory_space<vmem>>, vector<1x20x256xf32>
    %26 = vector.shape_cast %25 : vector<1x20x256xf32> to vector<20x256xf32>
    %27 = vector.extract_strided_slice %26 {offsets = [0, 64], sizes = [20, 192], strides = [1, 1]} : vector<20x256xf32> to vector<20x192xf32>
    %28 = vector.extract_strided_slice %26 {offsets = [0, 1], sizes = [20, 64], strides = [1, 1]} : vector<20x256xf32> to vector<20x64xf32>
    %29 = tpu.concatenate %27, %28 in 1 : vector<20x192xf32>, vector<20x64xf32> -> vector<20x256xf32>
    %cst_15 = arith.constant dense<0.000000e+00> : vector<10x256xf32>
    %30 = tpu.matmul %0, %26, %cst_15 {dimension_numbers = #tpu.dot_dimension_numbers<[1], [0], [0], [1], [0, 0, 1, 1], [], []>} : vector<10x20xf32>, vector<20x256xf32>, vector<10x256xf32> -> vector<10x256xf32>
    %cst_16 = arith.constant dense<0.000000e+00> : vector<10x256xf32>
    %31 = tpu.matmul %1, %29, %cst_16 {dimension_numbers = #tpu.dot_dimension_numbers<[1], [0], [0], [1], [0, 0, 1, 1], [], []>} : vector<10x20xf32>, vector<20x256xf32>, vector<10x256xf32> -> vector<10x256xf32>
    %32 = arith.addf %30, %31 : vector<10x256xf32>
    %33 = vector.extract_strided_slice %32 {offsets = [0, 0], sizes = [10, 64], strides = [1, 1]} : vector<10x256xf32> to vector<10x64xf32>
    %34 = vector.extract_strided_slice %32 {offsets = [0, 64], sizes = [10, 64], strides = [1, 1]} : vector<10x256xf32> to vector<10x64xf32>
    %35 = arith.maximumf %33, %34 : vector<10x64xf32>
    %36 = vector.extract_strided_slice %32 {offsets = [0, 128], sizes = [10, 64], strides = [1, 1]} : vector<10x256xf32> to vector<10x64xf32>
    %37 = vector.extract_strided_slice %32 {offsets = [0, 192], sizes = [10, 64], strides = [1, 1]} : vector<10x256xf32> to vector<10x64xf32>
    %38 = arith.maximumf %36, %37 : vector<10x64xf32>
    %39 = arith.maximumf %35, %38 : vector<10x64xf32>
    %40 = vector.broadcast %2 : vector<10x1xf32> to vector<10x64xf32>
    %41 = arith.addf %39, %40 : vector<10x64xf32>
    %cst_17 = arith.constant 0.000000e+00 : f32
    %42 = vector.broadcast %cst_17 : f32 to vector<10x64xf32>
    %43 = arith.maximumf %41, %42 : vector<10x64xf32>
    %c1_18 = arith.constant 1 : index
    %c0_19 = arith.constant 0 : index
    %c0_20 = arith.constant 0 : index
    %44 = vector.load %arg10[%c1_18, %c0_19, %c0_20] : memref<2x10x64xf32, #tpu.memory_space<vmem>>, vector<1x10x64xf32>
    %45 = vector.shape_cast %44 : vector<1x10x64xf32> to vector<10x64xf32>
    %46 = vector.shape_cast %43 : vector<10x64xf32> to vector<1x10x64xf32>
    tpu.vector_store %arg10[%c1_18, %c0_19, %c0_20], %46 {strides = array<i32>} : memref<2x10x64xf32, #tpu.memory_space<vmem>>, vector<1x10x64xf32>,
    %c0_21 = arith.constant 0 : index
    %c0_22 = arith.constant 0 : index
    %c0_23 = arith.constant 0 : index
    %47 = vector.load %arg10[%c0_21, %c0_22, %c0_23] : memref<2x10x64xf32, #tpu.memory_space<vmem>>, vector<2x1x64xf32>
    %48 = vector.shape_cast %47 : vector<2x1x64xf32> to vector<2x64xf32>
    %c0_24 = arith.constant 0 : index
    %c1_25 = arith.constant 1 : index
    %c0_26 = arith.constant 0 : index
    %49 = vector.load %arg10[%c0_24, %c1_25, %c0_26] : memref<2x10x64xf32, #tpu.memory_space<vmem>>, vector<2x1x64xf32>
    %50 = vector.shape_cast %49 : vector<2x1x64xf32> to vector<2x64xf32>
    %c0_27 = arith.constant 0 : index
    %c2 = arith.constant 2 : index
    %c0_28 = arith.constant 0 : index
    %51 = vector.load %arg10[%c0_27, %c2, %c0_28] : memref<2x10x64xf32, #tpu.memory_space<vmem>>, vector<2x1x64xf32>
    %52 = vector.shape_cast %51 : vector<2x1x64xf32> to vector<2x64xf32>
    %c0_29 = arith.constant 0 : index
    %c3 = arith.constant 3 : index
    %c0_30 = arith.constant 0 : index
    %53 = vector.load %arg10[%c0_29, %c3, %c0_30] : memref<2x10x64xf32, #tpu.memory_space<vmem>>, vector<2x1x64xf32>
    %54 = vector.shape_cast %53 : vector<2x1x64xf32> to vector<2x64xf32>
    %c0_31 = arith.constant 0 : index
    %c4 = arith.constant 4 : index
    %c0_32 = arith.constant 0 : index
    %55 = vector.load %arg10[%c0_31, %c4, %c0_32] : memref<2x10x64xf32, #tpu.memory_space<vmem>>, vector<2x1x64xf32>
    %56 = vector.shape_cast %55 : vector<2x1x64xf32> to vector<2x64xf32>
    %c0_33 = arith.constant 0 : index
    %c5 = arith.constant 5 : index
    %c0_34 = arith.constant 0 : index
    %57 = vector.load %arg10[%c0_33, %c5, %c0_34] : memref<2x10x64xf32, #tpu.memory_space<vmem>>, vector<2x1x64xf32>
    %58 = vector.shape_cast %57 : vector<2x1x64xf32> to vector<2x64xf32>
    %c0_35 = arith.constant 0 : index
    %c6 = arith.constant 6 : index
    %c0_36 = arith.constant 0 : index
    %59 = vector.load %arg10[%c0_35, %c6, %c0_36] : memref<2x10x64xf32, #tpu.memory_space<vmem>>, vector<2x1x64xf32>
    %60 = vector.shape_cast %59 : vector<2x1x64xf32> to vector<2x64xf32>
    %c0_37 = arith.constant 0 : index
    %c7 = arith.constant 7 : index
    %c0_38 = arith.constant 0 : index
    %61 = vector.load %arg10[%c0_37, %c7, %c0_38] : memref<2x10x64xf32, #tpu.memory_space<vmem>>, vector<2x1x64xf32>
    %62 = vector.shape_cast %61 : vector<2x1x64xf32> to vector<2x64xf32>
    %c0_39 = arith.constant 0 : index
    %c8 = arith.constant 8 : index
    %c0_40 = arith.constant 0 : index
    %63 = vector.load %arg10[%c0_39, %c8, %c0_40] : memref<2x10x64xf32, #tpu.memory_space<vmem>>, vector<2x1x64xf32>
    %64 = vector.shape_cast %63 : vector<2x1x64xf32> to vector<2x64xf32>
    %c0_41 = arith.constant 0 : index
    %c9 = arith.constant 9 : index
    %c0_42 = arith.constant 0 : index
    %65 = vector.load %arg10[%c0_41, %c9, %c0_42] : memref<2x10x64xf32, #tpu.memory_space<vmem>>, vector<2x1x64xf32>
    %66 = vector.shape_cast %65 : vector<2x1x64xf32> to vector<2x64xf32>
    %67 = tpu.concatenate %48, %50, %52, %54, %56, %58, %60, %62, %64, %66 in 1 : vector<2x64xf32>, vector<2x64xf32>, vector<2x64xf32>, vector<2x64xf32>, vector<2x64xf32>, vector<2x64xf32>, vector<2x64xf32>, vector<2x64xf32>, vector<2x64xf32>, vector<2x64xf32> -> vector<2x640xf32>
    %c0_43 = arith.constant 0 : index
    %c0_44 = arith.constant 0 : index
    %68 = vector.load %arg5[%c0_43, %c0_44] : memref<640x256xf32, #tpu.memory_space<vmem>>, vector<640x256xf32>
    %cst_45 = arith.constant dense<0.000000e+00> : vector<2x256xf32>
    %69 = tpu.matmul %67, %68, %cst_45 {dimension_numbers = #tpu.dot_dimension_numbers<[1], [0], [0], [1], [0, 0, 1, 1], [], []>} : vector<2x640xf32>, vector<640x256xf32>, vector<2x256xf32> -> vector<2x256xf32>
    %c0_46 = arith.constant 0 : index
    %c0_47 = arith.constant 0 : index
    %70 = vector.load %arg6[%c0_46, %c0_47] : memref<1x256xf32, #tpu.memory_space<vmem>>, vector<1x256xf32>
    %71 = vector.broadcast %70 : vector<1x256xf32> to vector<2x256xf32>
    %72 = arith.addf %69, %71 : vector<2x256xf32>
    %cst_48 = arith.constant 0.000000e+00 : f32
    %73 = vector.broadcast %cst_48 : f32 to vector<2x256xf32>
    %74 = arith.maximumf %72, %73 : vector<2x256xf32>
    %c0_49 = arith.constant 0 : index
    %c0_50 = arith.constant 0 : index
    %75 = vector.load %arg7[%c0_49, %c0_50] : memref<256x128xf32, #tpu.memory_space<vmem>>, vector<256x128xf32>
    %cst_51 = arith.constant dense<0.000000e+00> : vector<2x128xf32>
    %76 = tpu.matmul %74, %75, %cst_51 {dimension_numbers = #tpu.dot_dimension_numbers<[1], [0], [0], [1], [0, 0, 1, 1], [], []>} : vector<2x256xf32>, vector<256x128xf32>, vector<2x128xf32> -> vector<2x128xf32>
    %c0_52 = arith.constant 0 : index
    %c0_53 = arith.constant 0 : index
    %77 = vector.load %arg8[%c0_52, %c0_53] : memref<1x128xf32, #tpu.memory_space<vmem>>, vector<1x128xf32>
    %78 = vector.broadcast %77 : vector<1x128xf32> to vector<2x128xf32>
    %79 = arith.addf %76, %78 : vector<2x128xf32>
    %cst_54 = arith.constant 0.000000e+00 : f32
    %80 = vector.broadcast %cst_54 : f32 to vector<2x128xf32>
    %81 = arith.maximumf %79, %80 : vector<2x128xf32>
    %82 = tpu.iota {dimensions = array<i32: 1>} : vector<2x128xi32>
    %c4_i32 = arith.constant 4 : i32
    %83 = vector.broadcast %c4_i32 : i32 to vector<2x128xi32>
    %84 = arith.cmpi slt, %82, %83 : vector<2x128xi32>
    %cst_55 = arith.constant -1.000000e+30 : f32
    %85 = vector.broadcast %cst_55 : f32 to vector<2x128xf32>
    %86 = arith.select %84, %81, %85 : vector<2x128xi1>, vector<2x128xf32>
    %cst_56 = arith.constant dense<0xFF800000> : vector<2xf32>
    %87 = vector.multi_reduction <maximumf>, %86, %cst_56 [1] : vector<2x128xf32> to vector<2xf32>
    %88 = vector.shape_cast %87 : vector<2xf32> to vector<2x1xf32>
    %89 = vector.broadcast %88 : vector<2x1xf32> to vector<2x128xf32>
    %90 = arith.subf %86, %89 : vector<2x128xf32>
    %91 = math.exp %90 : vector<2x128xf32>
    %cst_57 = arith.constant dense<0.000000e+00> : vector<2xf32>
    %92 = vector.multi_reduction <add>, %91, %cst_57 [1] : vector<2x128xf32> to vector<2xf32>
    %93 = vector.shape_cast %92 : vector<2xf32> to vector<2x1xf32>
    %94 = tpu.reciprocal %93 : vector<2x1xf32> -> vector<2x1xf32>
    %95 = vector.broadcast %94 : vector<2x1xf32> to vector<2x128xf32>
    %96 = arith.mulf %91, %95 : vector<2x128xf32>
    %c0_58 = arith.constant 0 : index
    %c0_59 = arith.constant 0 : index
    %97 = vector.load %arg9[%c0_58, %c0_59] : memref<2x128xf32, #tpu.memory_space<vmem>>, vector<2x128xf32>
    tpu.vector_store %arg9[%c0_58, %c0_59], %96 {strides = array<i32>} : memref<2x128xf32, #tpu.memory_space<vmem>>, vector<2x128xf32>,
    return
  }
  func.func @transform_0(%arg0: i32) -> (i32, i32, i32) {
    %c0_i32 = arith.constant 0 : i32
    %c0_i32_0 = arith.constant 0 : i32
    %c0_i32_1 = arith.constant 0 : i32
    return %arg0, %c0_i32, %c0_i32_0 : i32, i32, i32
  }
  func.func @transform_1(%arg0: i32) -> (i32, i32) {
    %c0_i32 = arith.constant 0 : i32
    %c0_i32_0 = arith.constant 0 : i32
    %c0_i32_1 = arith.constant 0 : i32
    return %c0_i32, %c0_i32_0 : i32, i32
  }
  func.func @transform_2(%arg0: i32) -> (i32, i32) {
    %c0_i32 = arith.constant 0 : i32
    %c0_i32_0 = arith.constant 0 : i32
    %c0_i32_1 = arith.constant 0 : i32
    return %c0_i32, %c0_i32_0 : i32, i32
  }
  func.func @transform_3(%arg0: i32) -> (i32, i32) {
    %c0_i32 = arith.constant 0 : i32
    %c0_i32_0 = arith.constant 0 : i32
    %c0_i32_1 = arith.constant 0 : i32
    return %c0_i32, %c0_i32_0 : i32, i32
  }
  func.func @transform_4(%arg0: i32) -> (i32, i32) {
    %c0_i32 = arith.constant 0 : i32
    %c0_i32_0 = arith.constant 0 : i32
    %c0_i32_1 = arith.constant 0 : i32
    return %c0_i32, %c0_i32_0 : i32, i32
  }
  func.func @transform_5(%arg0: i32) -> (i32, i32) {
    %c0_i32 = arith.constant 0 : i32
    %c0_i32_0 = arith.constant 0 : i32
    %c0_i32_1 = arith.constant 0 : i32
    return %c0_i32, %c0_i32_0 : i32, i32
  }
  func.func @transform_6(%arg0: i32) -> (i32, i32) {
    %c0_i32 = arith.constant 0 : i32
    %c0_i32_0 = arith.constant 0 : i32
    %c0_i32_1 = arith.constant 0 : i32
    return %c0_i32, %c0_i32_0 : i32, i32
  }
  func.func @transform_7(%arg0: i32) -> (i32, i32) {
    %c0_i32 = arith.constant 0 : i32
    %c0_i32_0 = arith.constant 0 : i32
    %c0_i32_1 = arith.constant 0 : i32
    return %c0_i32, %c0_i32_0 : i32, i32
  }
  func.func @transform_8(%arg0: i32) -> (i32, i32) {
    %c0_i32 = arith.constant 0 : i32
    %c0_i32_0 = arith.constant 0 : i32
    return %arg0, %c0_i32 : i32, i32
  }
}

</mosaic_0001>

<bundles_post_ra>
// kernel: cnn_forward.1
= control target key start
LH: loop header
LB: loop body
LE: loop exit
PB: predicated region body
PF: predicated region fallthrough
CT: control target
= control target key end

     0   :  { %13 = vsyncpa [#allocation4], 0  ;;  %s1944_s0 = inlined_call_operand.vmem [shape: f32[2,20,256], index: 0, kind: input, shape index: {}]   ;;  %s1945_s1 = inlined_call_operand.vmem [shape: f32[10,20], index: 1, kind: input, shape index: {}]   ;;  %s1946_s2 = inlined_call_operand.vmem [shape: f32[10,20], index: 2, kind: input, shape index: {}]   ;;  %s1947_s3 = inlined_call_operand.vmem [shape: f32[10,1], index: 3, kind: input, shape index: {}]   ;;  %s1948_s4 = inlined_call_operand.hbm [shape: f32[640,256], index: 4, kind: input, shape index: {}]   ;;  %s1949_s5 = inlined_call_operand.vmem [shape: f32[1,256], index: 5, kind: input, shape index: {}]   ;;  %s1950_s6 = inlined_call_operand.vmem [shape: f32[256,128], index: 6, kind: input, shape index: {}]   ;;  %s1951_s7 = inlined_call_operand.vmem [shape: f32[1,128], index: 7, kind: input, shape index: {}]   ;;  %s1952_s8 = inlined_call_operand.hbm [shape: f32[2,128], index: 8, kind: output, shape index: {}]  }
   0x1   :  { %14 = vsyncpa [#allocation5], 0  ;;  %s1544_s27 = smov [#allocation3]   ;;  %s1496_s9 = scalar_lea.hbm %s1948_s4, 20480 }
   0x2   :  { %s28_s28 = sshll.u32 %s1544_s27, 4  ;;  %p1497_p0 = scmp.ne.s32.totalorder %s1948_s4, %s1496_s9  ;;  %s29_s28 = int_to_ptr.vmem [resolvable:$true] %s28_s28 }
   0x3   :  { %p1500_p1 = scmp.lt.u32.totalorder %s1496_s9, %s1948_s4 }
   0x5   :  { %p1502_p2 = pnand %p1500_p1, %p1497_p0 }
   0x7   :  { %1505 = shalt.err (!%p1502_p2)
}
   0x8   :  { %s1506_s14 = scalar_lea.vmem %s29_s28, 20480  ;;  %p1511_p4 = scmp.lt.s32.totalorder %s29_s28, %s29_s28 }
   0x9   :  { %p1507_p3 = scmp.ne.s32.totalorder %s29_s28, %s1506_s14  ;;  %p1512_p5 = scmp.lt.s32.totalorder %s1506_s14, %s1506_s14 }
   0xb   :  { %p1513_p6 = por %p1512_p5, %p1511_p4 }
   0xd   :  { %p1514_p7 = pnand %p1513_p6, %p1507_p3 }
   0xf   :  { %1517 = shalt.err (!%p1514_p7)
}
  0x10   :  { %s1545_s15 = smov 256   ;;  %s1546_s16 = smov 16  }
  0x11   :  { %34 = dma.hbm_to_vmem [thread:$0]  %s1948_s4, 20480, %s29_s28, [#allocation4], %s1545_s15, %s1545_s15, %s1546_s16  }
  0x12   :  { %1540 = dma.done.wait [#allocation4], 20480  }
  0x13   :  { %1541 = vsyncadd [#allocation4], 4294946816  ;;  %v1612_v0 = vld [vmem:[%s1944_s0 + $0x38] sm:$0xff]  ;;  %v1617_v1 = vld [vmem:[%s1944_s0 + $0x48] sm:$0xff]  ;;  %s1547_s30 = smov 64   ;;  %s1548_s13 = smov 63  }
  0x14   :  { %v1622_v2 = vld [vmem:[%s1944_s0 + $0x30] sm:$0xff]  ;;  %v1451_v3 = vpack.i.bf16 %v1617_v1, %v1612_v0  ;;  %v1233_v4 = vpack.c.bf16 %v1617_v1, %v1612_v0  ;;  %v1631_v5 = vld [vmem:[%s1944_s0 + $0x40] sm:$0xff]  ;;  %v1636_v6 = vld [vmem:[%s1944_s0 + $0x8] sm:$0xff]  ;;  %v1549_v14 = vmov 0.0   ;;  %v1550_v22 = vmov 0  }
  0x15   :  { %v1641_v7 = vld [vmem:[%s1944_s0 + $0x18] sm:$0xff]  ;;  %v1461_v8 = vpack.i.bf16 %v1631_v5, %v1622_v2  ;;  %v1235_v9 = vpack.c.bf16 %v1631_v5, %v1622_v2  ;;  %v1654_v11 = vld [vmem:[%s1944_s0] sm:$0xff]  ;;  %v1659_v12 = vld [vmem:[%s1944_s0 + $0x10] sm:$0xff]  ;;  %425 = vmatprep.mubr.f32.mxu1 %v1549_v14  ;;  %172 = vmatprep.mubr.f32.mxu0 %v1549_v14  ;;  %vm74_vm0 = vcmask 523264   ;;  %vm102_vm1 = vcmask 1043456  }
  0x16   :  { %1452 = vrot.lane.b32.xlu0 %v1451_v3, %s1547_s30  ;;  %v1466_v10 = vpack.i.bf16 %v1641_v7, %v1636_v6  ;;  %v1471_v13 = vpack.i.bf16 %v1659_v12, %v1654_v11  ;;  %v1670_v15 = vld [vmem:[%s1944_s0 + $0x58] sm:$0xf]  ;;  %v1675_v16 = vld [vmem:[%s1944_s0 + $0x50] sm:$0xf]  ;;  %v1225_v17 = vpack.c.bf16 %v1641_v7, %v1636_v6  ;;  %v1227_v18 = vpack.c.bf16 %v1659_v12, %v1654_v11  ;;  %v1687_v19 = vld [vmem:[%s1944_s0 + $0x28] sm:$0xf] }
  0x17   :  { %1462 = vrot.lane.b32.xlu1 %v1461_v8, %s1547_s30  ;;  %v1696_v20 = vld [vmem:[%s1944_s0 + $0x20] sm:$0xf]  ;;  %1481 = vset.pattern.permute.xlu0 %v1550_v22  ;;  %vm95_vm2 = vcmask 162816   ;;  %v47_v61 = vld [vmem:[%s1946_s2 + $0x8] sm:$0x3]  ;;  %vm571_vm3 = vcmask 1041409  }
  0x18   :  { %v48_v21 = vld [vmem:[%s1947_s3] sm:$0xff]  ;;  %v45_v2 = vld [vmem:[%s1945_s1 + $0x8] sm:$0x3]  ;;  %vm309_vm4 = vcmask 517120   ;;  %vm1135_vm6 = vcmask 1041408  }
  0x19   :  { %v46_v57 = vld [vmem:[%s1946_s2] sm:$0xff]  ;;  %v699_v12 = vld [vmem:[#allocation3 + $0x208] sm:$0xff] }
  0x1a   :  { %1457 = vrot.lane.b32.xlu0 %v1461_v8, %s1548_s13  ;;  %v44_v1 = vld [vmem:[%s1945_s1] sm:$0xff] }
  0x1b   :  { %1467 = vrot.lane.b32.xlu1 %v1466_v10, %s1547_s30  ;;  %v634_v22 = vld [vmem:[#allocation3] sm:$0xff] }
  0x1e   :  { %1472 = vrot.lane.b32.xlu0 %v1471_v13, %s1548_s13 }
  0x1f   :  { %1477 = vrot.lane.b32.xlu1 %v1471_v13, %s1547_s30  ;;  %v701_v13 = vld [vmem:[#allocation3 + $0x218] sm:$0xff] }
  0x22   :  { %334 = vrot.lane.b32.xlu0 %v1670_v15, %s1547_s30 }
  0x23   :  { %348 = vrot.lane.b32.xlu1 %v1675_v16, %s1548_s13 }
  0x26   :  { %332 = vrot.lane.b32.xlu0 %v1675_v16, %s1547_s30 }
  0x27   :  { %72 = vrot.lane.b32.xlu1 %v1687_v19, %s1547_s30 }
  0x2a   :  { %87 = vrot.lane.b32.xlu0 %v1696_v20, %s1548_s13 }
  0x2b   :  { %70 = vrot.lane.b32.xlu1 %v1696_v20, %s1547_s30 }
  0x2e   :  { %296 = vperm.xlu0 %1481, %v48_v21  }
  0x88   :  { %v1453_v23 = vpop.permute.xlu0 %1452 }
  0x89   :  { %v1463_v24 = vpop.permute.xlu1 %1462  ;;  %v1455_v25 = vunpack.i.h.bf16 %v1453_v23  ;;  %v1454_v26 = vunpack.i.l.bf16 %v1453_v23  ;;  %v636_v23 = vld [vmem:[#allocation3 + $0x10] sm:$0xff] }
  0x8a   :  { %v1465_v27 = vunpack.i.h.bf16 %v1463_v24  ;;  %v1464_v28 = vunpack.i.l.bf16 %v1463_v24  ;;  %v703_v24 = vld [vmem:[#allocation3 + $0x228] sm:$0xff] }
  0x8c   :  { %v1458_v29 = vpop.permute.xlu0 %1457  ;;  %v336_v33 = vsel %vm74_vm0, %v1464_v28, %v1454_v26  ;;  %v337_v34 = vsel %vm74_vm0, %v1465_v27, %v1455_v25  ;;  %v639_v27 = vld [vmem:[#allocation3 + $0x28] sm:$0xff]  ;;  %v641_v28 = vld [vmem:[#allocation3 + $0x38] sm:$0xff] }
  0x8d   :  { %v1460_v30 = vunpack.i.h.bf16 %v1458_v29  ;;  %v1459_v31 = vunpack.i.l.bf16 %v1458_v29  ;;  %v1468_v32 = vpop.permute.xlu1 %1467  ;;  %v1231_v44 = vpack.c.bf16 %v337_v34, %v336_v33  ;;  %v638_v33 = vld [vmem:[#allocation3 + $0x20] sm:$0xff] }
  0x8e   :  { %v1470_v35 = vunpack.i.h.bf16 %v1468_v32  ;;  %v1469_v36 = vunpack.i.l.bf16 %v1468_v32  ;;  %v704_v32 = vld [vmem:[#allocation3 + $0x230] sm:$0xff] }
  0x8f   :  { %v353_v37 = vsel %vm74_vm0, %v1454_v26, %v1459_v31  ;;  %v354_v38 = vsel %vm74_vm0, %v1455_v25, %v1460_v30  ;;  %v1239_v25 = vpack.c.bf16 %v636_v23, %v634_v22  ;;  %v705_v26 = vld [vmem:[#allocation3 + $0x238] sm:$0xff]  ;;  %v1241_v30 = vpack.c.bf16 %v641_v28, %v639_v27  ;;  %v702_v31 = vld [vmem:[#allocation3 + $0x220] sm:$0xff]  ;;  %v656_v27 = vld [vmem:[#allocation3 + $0xb0] sm:$0xff] }
  0x90   :  { %v1473_v39 = vpop.permute.xlu0 %1472  ;;  %v1229_v40 = vpack.c.bf16 %v354_v38, %v353_v37  ;;  %v1305_v29 = vpack.c.bf16 %v705_v26, %v703_v24  ;;  %v1307_v34 = vpack.c.bf16 %v704_v32, %v702_v31  ;;  %v709_v37 = vld [vmem:[#allocation3 + $0x258] sm:$0xff]  ;;  %v718_v23 = vld [vmem:[#allocation3 + $0x2a0] sm:$0xff]  ;;  %v720_v24 = vld [vmem:[#allocation3 + $0x2b0] sm:$0xff] }
  0x91   :  { %v1478_v41 = vpop.permute.xlu1 %1477  ;;  %v1475_v42 = vunpack.i.h.bf16 %v1473_v39  ;;  %v1474_v43 = vunpack.i.l.bf16 %v1473_v39  ;;  %v723_v28 = vld [vmem:[#allocation3 + $0x2c8] sm:$0xff]  ;;  %v661_v31 = vld [vmem:[#allocation3 + $0xd8] sm:$0xff]  ;;  %v1323_v32 = vpack.c.bf16 %v720_v24, %v718_v23 }
  0x92   :  { %v1480_v45 = vunpack.i.h.bf16 %v1478_v41  ;;  %v1479_v46 = vunpack.i.l.bf16 %v1478_v41  ;;  %1230 = vmatprep.subr.bf16.mxu1 %v1229_v40  ;;  %v643_v40 = vld [vmem:[#allocation3 + $0x48] sm:$0xff]  ;;  %v645_v41 = vld [vmem:[#allocation3 + $0x58] sm:$0xff] }
  0x93   :  { %1232 = vmatpush1.bf16.msra.mxu1 %v1231_v44  ;;  %v92_v47 = vsel %vm74_vm0, %v1469_v36, %v1474_v43  ;;  %v93_v48 = vsel %vm74_vm0, %v1470_v35, %v1475_v42  ;;  %v706_v42 = vld [vmem:[#allocation3 + $0x240] sm:$0xff]  ;;  %v1245_v43 = vpack.c.bf16 %v645_v41, %v643_v40  ;;  %v708_v44 = vld [vmem:[#allocation3 + $0x250] sm:$0xff]  ;;  %v727_v40 = vld [vmem:[#allocation3 + $0x2e8] sm:$0xff] }
  0x94   :  { %v335_v49 = vpop.permute.xlu0 %334  ;;  %v1221_v50 = vpack.c.bf16 %v93_v48, %v92_v47  ;;  %v75_v51 = vsel %vm74_vm0, %v1479_v46, %v1469_v36  ;;  %v76_v52 = vsel %vm74_vm0, %v1480_v45, %v1470_v35  ;;  %v640_v35 = vld [vmem:[#allocation3 + $0x30] sm:$0xff]  ;;  %v707_v36 = vld [vmem:[#allocation3 + $0x248] sm:$0xff]  ;;  %v642_v45 = vld [vmem:[#allocation3 + $0x40] sm:$0xff]  ;;  %v1311_v47 = vpack.c.bf16 %v708_v44, %v706_v42 }
  0x95   :  { %v349_v53 = vpop.permute.xlu1 %348  ;;  %v1223_v54 = vpack.c.bf16 %v76_v52, %v75_v51  ;;  %v1243_v38 = vpack.c.bf16 %v640_v35, %v638_v33  ;;  %v1309_v39 = vpack.c.bf16 %v709_v37, %v707_v36  ;;  %v644_v46 = vld [vmem:[#allocation3 + $0x50] sm:$0xff]  ;;  %v711_v48 = vld [vmem:[#allocation3 + $0x268] sm:$0xff]  ;;  %v722_v35 = vld [vmem:[#allocation3 + $0x2c0] sm:$0xff] }
  0x96   :  { %v355_v55 = vsel %vm74_vm0, %v335_v49, %v349_v53  ;;  %1222 = vmatprep.subr.bf16.mxu0 %v1221_v50  ;;  %v647_v50 = vld [vmem:[#allocation3 + $0x68] sm:$0xff]  ;;  %v1247_v51 = vpack.c.bf16 %v644_v46, %v642_v45  ;;  %v649_v53 = vld [vmem:[#allocation3 + $0x78] sm:$0xff]  ;;  %v724_v36 = vld [vmem:[#allocation3 + $0x2d0] sm:$0xff] }
  0x97   :  { %1177 = vmatprep.subr.msk.mxu1 %vm102_vm1, %v355_v55  ;;  %1224 = vmatpush1.bf16.msra.mxu0 %v1223_v54  ;;  %v710_v54 = vld [vmem:[#allocation3 + $0x260] sm:$0xff]  ;;  %v712_v55 = vld [vmem:[#allocation3 + $0x270] sm:$0xff]  ;;  %v729_v41 = vld [vmem:[#allocation3 + $0x2f8] sm:$0xff]  ;;  %v1327_v44 = vpack.c.bf16 %v724_v36, %v722_v35 }
  0x98   :  { %v333_v56 = vpop.permute.xlu0 %332  ;;  %v658_v37 = vld [vmem:[#allocation3 + $0xc0] sm:$0xff]  ;;  %v663_v42 = vld [vmem:[#allocation3 + $0xe8] sm:$0xff]  ;;  %v1329_v46 = vpack.c.bf16 %v729_v41, %v727_v40  ;;  %v677_v24 = vld [vmem:[#allocation3 + $0x158] sm:$0xff] }
  0x99   :  { %v73_v58 = vpop.permute.xlu1 %72  ;;  %v338_v59 = vsel %vm74_vm0, %v333_v56, %v335_v49  ;;  %v713_v49 = vld [vmem:[#allocation3 + $0x278] sm:$0xff]  ;;  %v1249_v56 = vpack.c.bf16 %v649_v53, %v647_v50  ;;  %v675_v23 = vld [vmem:[#allocation3 + $0x148] sm:$0xff]  ;;  %v742_v40 = vld [vmem:[#allocation3 + $0x360] sm:$0xff] }
  0x9a   :  { %1178 = vmatpush1.msk.msra.mxu1 %vm102_vm1, %v338_v59  ;;  %v1313_v52 = vpack.c.bf16 %v713_v49, %v711_v48  ;;  %v715_v59 = vld [vmem:[#allocation3 + $0x288] sm:$0xff]  ;;  %v728_v48 = vld [vmem:[#allocation3 + $0x2f0] sm:$0xff]  ;;  %v662_v49 = vld [vmem:[#allocation3 + $0xe0] sm:$0xff] }
  0x9b   :  { %1179 = vmatmul.mubr.msk.f32.vlgmr.msra.gmra.mrb[0].mxu1 %vm95_vm2, %v46_v57  ;;  %1234 = vmatprep.subr.bf16.mxu1 %v1233_v4  ;;  %v733_v53 = vld [vmem:[#allocation3 + $0x318] sm:$0xff]  ;;  %v679_v35 = vld [vmem:[#allocation3 + $0x168] sm:$0xff]  ;;  %v744_v41 = vld [vmem:[#allocation3 + $0x370] sm:$0xff] }
  0x9c   :  { %v88_v60 = vpop.permute.xlu0 %87  ;;  %1236 = vmatpush1.bf16.msra.mxu1 %v1235_v9  ;;  %431 = vmatprep.mubr.f32.mxu1 %v1549_v14  ;;  %v49_v9 = vld [vmem:[%s1947_s3 + $0x8] sm:$0x3]  ;;  %v681_v36 = vld [vmem:[#allocation3 + $0x178] sm:$0xff] }
  0x9d   :  { %v71_v62 = vpop.permute.xlu1 %70  ;;  %v94_v63 = vsel %vm74_vm0, %v73_v58, %v88_v60  ;;  %1181 = vmatprep.subr.msk.mxu1 %vm102_vm1, %v1670_v15  ;;  %v635_v15 = vld [vmem:[#allocation3 + $0x8] sm:$0xff]  ;;  %v717_v60 = vld [vmem:[#allocation3 + $0x298] sm:$0xff] }
  0x9e   :  { %v77_v0 = vsel %vm74_vm0, %v71_v62, %v73_v58  ;;  %1163 = vmatprep.subr.msk.mxu0 %vm102_vm1, %v94_v63  ;;  %v648_v58 = vld [vmem:[#allocation3 + $0x70] sm:$0xff]  ;;  %v653_v62 = vld [vmem:[#allocation3 + $0x98] sm:$0xff]  ;;  %v1315_v63 = vpack.c.bf16 %v712_v55, %v710_v54  ;;  %v667_v54 = vld [vmem:[#allocation3 + $0x108] sm:$0xff] }
  0x9f   :  { %1164 = vmatpush1.msk.msra.mxu0 %vm102_vm1, %v77_v0  ;;  %1180 = vmatmul.mubr.msk.f32.gmra.mrb[2].mxu1 %vm95_vm2, %v47_v61  ;;  %v669_v55 = vld [vmem:[#allocation3 + $0x118] sm:$0xff] }
  0xa0   :  { %1165 = vmatmul.mubr.msk.f32.vlgmr.msra.gmra.mrb[0].mxu0 %vm95_vm2, %v46_v57  ;;  %1182 = vmatpush1.msk.msra.mxu1 %vm102_vm1, %v1675_v16  ;;  %v1301_v16 = vpack.c.bf16 %v701_v13, %v699_v12  ;;  %v646_v57 = vld [vmem:[#allocation3 + $0x60] sm:$0xff] }
  0xa1   :  { %1226 = vmatprep.subr.bf16.mxu0 %v1225_v17  ;;  %506 = vmatprep.mubr.f32.mxu1 %v1549_v14  ;;  %v637_v17 = vld [vmem:[#allocation3 + $0x18] sm:$0xff]  ;;  %v1251_v0 = vpack.c.bf16 %v648_v58, %v646_v57  ;;  %v650_v12 = vld [vmem:[#allocation3 + $0x80] sm:$0xff] }
  0xa2   :  { %178 = vmatprep.mubr.f32.mxu0 %v1549_v14  ;;  %1228 = vmatpush1.bf16.msra.mxu0 %v1227_v18  ;;  %v698_v18 = vld [vmem:[#allocation3 + $0x200] sm:$0xff] }
  0xa3   :  { %1183 = vmatmul.mubr.msk.f32.vlgmr.msra.gmra.mrb[0].mxu1 %vm95_vm2, %v44_v1  ;;  %1167 = vmatprep.subr.msk.mxu0 %vm102_vm1, %v1687_v19  ;;  %v700_v19 = vld [vmem:[#allocation3 + $0x210] sm:$0xff] }
  0xa4   :  { %1166 = vmatmul.mubr.msk.f32.gmra.mrb[2].mxu0 %vm95_vm2, %v47_v61  ;;  %512 = vmatprep.mubr.f32.mxu1 %v1549_v14  ;;  %v1303_v21 = vpack.c.bf16 %v700_v19, %v698_v18  ;;  %v651_v61 = vld [vmem:[#allocation3 + $0x88] sm:$0xff]  ;;  %v657_v19 = vld [vmem:[#allocation3 + $0xb8] sm:$0xff] }
  0xa5   :  { %259 = vmatprep.mubr.f32.mxu0 %v1549_v14  ;;  %v1253_v13 = vpack.c.bf16 %v653_v62, %v651_v61  ;;  %v655_v18 = vld [vmem:[#allocation3 + $0xa8] sm:$0xff]  ;;  %v666_v61 = vld [vmem:[#allocation3 + $0x100] sm:$0xff]  ;;  %v1269_v62 = vpack.c.bf16 %v669_v55, %v667_v54 }
  0xa6   :  { %1168 = vmatpush1.msk.msra.mxu0 %vm102_vm1, %v1696_v20  ;;  %v1237_v20 = vpack.c.bf16 %v637_v17, %v635_v15  ;;  %v652_v15 = vld [vmem:[#allocation3 + $0x90] sm:$0xff]  ;;  %v721_v17 = vld [vmem:[#allocation3 + $0x2b8] sm:$0xff]  ;;  %v1257_v26 = vpack.c.bf16 %v657_v19, %v655_v18  ;;  %v670_v18 = vld [vmem:[#allocation3 + $0x120] sm:$0xff] }
  0xa7   :  { %1184 = vmatmul.mubr.msk.f32.gmra.mrb[2].mxu1 %vm95_vm2, %v45_v2  ;;  %1302 = vmatprep.subr.bf16.mxu0 %v1301_v16  ;;  %v719_v16 = vld [vmem:[#allocation3 + $0x2a8] sm:$0xff]  ;;  %v682_v54 = vld [vmem:[#allocation3 + $0x180] sm:$0xff] }
  0xa8   :  { %1169 = vmatmul.mubr.msk.f32.vlgmr.msra.gmra.mrb[0].mxu0 %vm95_vm2, %v44_v1  ;;  %1238 = vmatprep.subr.bf16.mxu1 %v1237_v20  ;;  %v1317_v1 = vpack.c.bf16 %v717_v60, %v715_v59  ;;  %v1321_v22 = vpack.c.bf16 %v721_v17, %v719_v16  ;;  %v730_v59 = vld [vmem:[#allocation3 + $0x300] sm:$0xff]  ;;  %v732_v60 = vld [vmem:[#allocation3 + $0x310] sm:$0xff] }
  0xa9   :  { %265 = vmatprep.mubr.f32.mxu0 %v1549_v14  ;;  %1304 = vmatpush1.bf16.msra.mxu0 %v1303_v21  ;;  %v1255_v21 = vpack.c.bf16 %v652_v15, %v650_v12  ;;  %v1335_v12 = vpack.c.bf16 %v732_v60, %v730_v59  ;;  %v734_v16 = vld [vmem:[#allocation3 + $0x320] sm:$0xff]  ;;  %v736_v17 = vld [vmem:[#allocation3 + $0x330] sm:$0xff]  ;;  %v687_v59 = vld [vmem:[#allocation3 + $0x1a8] sm:$0xff] }
  0xaa   :  { %1240 = vmatpush1.bf16.msra.mxu1 %v1239_v25  ;;  %1306 = vmatprep.subr.bf16.mxu0 %v1305_v29  ;;  %v654_v25 = vld [vmem:[#allocation3 + $0xa0] sm:$0xff]  ;;  %v725_v29 = vld [vmem:[#allocation3 + $0x2d8] sm:$0xff] }
  0xab   :  { %1242 = vmatprep.subr.bf16.mxu1 %v1241_v30  ;;  %v659_v30 = vld [vmem:[#allocation3 + $0xc8] sm:$0xff]  ;;  %v1259_v33 = vpack.c.bf16 %v656_v27, %v654_v25  ;;  %v1339_v25 = vpack.c.bf16 %v736_v17, %v734_v16  ;;  %v689_v60 = vld [vmem:[#allocation3 + $0x1b8] sm:$0xff] }
  0xac   :  { %1170 = vmatmul.mubr.msk.f32.gmra.mrb[2].mxu0 %vm95_vm2, %v45_v2  ;;  %v714_v2 = vld [vmem:[#allocation3 + $0x280] sm:$0xff]  ;;  %v691_v16 = vld [vmem:[#allocation3 + $0x1c8] sm:$0xff]  ;;  %v693_v17 = vld [vmem:[#allocation3 + $0x1d8] sm:$0xff] }
  0xad   :  { %1308 = vmatpush1.bf16.msra.mxu0 %v1307_v34  ;;  %v1325_v34 = vpack.c.bf16 %v725_v29, %v723_v28  ;;  %v738_v28 = vld [vmem:[#allocation3 + $0x340] sm:$0xff]  ;;  %v740_v29 = vld [vmem:[#allocation3 + $0x350] sm:$0xff] }
  0xae   :  { %1244 = vmatpush1.bf16.msra.mxu1 %v1243_v38  ;;  %1310 = vmatprep.subr.bf16.mxu0 %v1309_v39  ;;  %v1261_v38 = vpack.c.bf16 %v661_v31, %v659_v30  ;;  %v660_v39 = vld [vmem:[#allocation3 + $0xd0] sm:$0xff]  ;;  %v674_v30 = vld [vmem:[#allocation3 + $0x140] sm:$0xff]  ;;  %v1277_v31 = vpack.c.bf16 %v677_v24, %v675_v23  ;;  %v1293_v24 = vpack.c.bf16 %v693_v17, %v691_v16 }
  0xaf   :  { %1246 = vmatprep.subr.bf16.mxu1 %v1245_v43  ;;  %v665_v43 = vld [vmem:[#allocation3 + $0xf8] sm:$0xff]  ;;  %v1263_v45 = vpack.c.bf16 %v660_v39, %v658_v37  ;;  %v1343_v37 = vpack.c.bf16 %v740_v29, %v738_v28  ;;  %v690_v23 = vld [vmem:[#allocation3 + $0x1c0] sm:$0xff] }
  0xb0   :  { %v1265_v50 = vpack.c.bf16 %v665_v43, %v663_v42  ;;  %v678_v42 = vld [vmem:[#allocation3 + $0x160] sm:$0xff]  ;;  %v1281_v43 = vpack.c.bf16 %v681_v36, %v679_v35 }
  0xb1   :  { %1312 = vmatpush1.bf16.msra.mxu0 %v1311_v47  ;;  %v726_v47 = vld [vmem:[#allocation3 + $0x2e0] sm:$0xff] }
  0xb2   :  { %1248 = vmatpush1.bf16.msra.mxu1 %v1247_v51  ;;  %1314 = vmatprep.subr.bf16.mxu0 %v1313_v52  ;;  %v664_v51 = vld [vmem:[#allocation3 + $0xf0] sm:$0xff]  ;;  %v731_v52 = vld [vmem:[#allocation3 + $0x308] sm:$0xff] }
  0xb3   :  { %1250 = vmatprep.subr.bf16.mxu1 %v1249_v56  ;;  %v1331_v56 = vpack.c.bf16 %v728_v48, %v726_v47  ;;  %v1267_v57 = vpack.c.bf16 %v664_v51, %v662_v49  ;;  %v1333_v58 = vpack.c.bf16 %v733_v53, %v731_v52  ;;  %v683_v47 = vld [vmem:[#allocation3 + $0x188] sm:$0xff]  ;;  %v685_v48 = vld [vmem:[#allocation3 + $0x198] sm:$0xff]  ;;  %v1347_v49 = vpack.c.bf16 %v744_v41, %v742_v40  ;;  %v746_v52 = vld [vmem:[#allocation3 + $0x380] sm:$0xff] }
  0xb4   :  { %v748_v53 = vld [vmem:[#allocation3 + $0x390] sm:$0xff]  ;;  %v1285_v55 = vpack.c.bf16 %v685_v48, %v683_v47  ;;  %v758_v47 = vld [vmem:[#allocation3 + $0x3e0] sm:$0xff] }
  0xb5   :  { %1316 = vmatpush1.bf16.msra.mxu0 %v1315_v63  ;;  %v668_v63 = vld [vmem:[#allocation3 + $0x110] sm:$0xff] }
  0xb6   :  { %1252 = vmatpush1.bf16.msra.mxu1 %v1251_v0  ;;  %1318 = vmatprep.subr.bf16.mxu0 %v1317_v1  ;;  %v735_v0 = vld [vmem:[#allocation3 + $0x328] sm:$0xff]  ;;  %v737_v1 = vld [vmem:[#allocation3 + $0x338] sm:$0xff] }
  0xb7   :  { %1254 = vmatprep.subr.bf16.mxu1 %v1253_v13  ;;  %v1271_v13 = vpack.c.bf16 %v668_v63, %v666_v61  ;;  %v1337_v15 = vpack.c.bf16 %v737_v1, %v735_v0  ;;  %v1351_v61 = vpack.c.bf16 %v748_v53, %v746_v52  ;;  %v750_v0 = vld [vmem:[#allocation3 + $0x3a0] sm:$0xff]  ;;  %v752_v1 = vld [vmem:[#allocation3 + $0x3b0] sm:$0xff] }
  0xba   :  { %1256 = vmatpush1.bf16.msra.mxu1 %v1255_v21  ;;  %v739_v21 = vld [vmem:[#allocation3 + $0x348] sm:$0xff] }
  0xbb   :  { %1258 = vmatprep.subr.bf16.mxu1 %v1257_v26 }
  0xbe   :  { %1260 = vmatpush1.bf16.msra.mxu1 %v1259_v33  ;;  %v743_v33 = vld [vmem:[#allocation3 + $0x368] sm:$0xff] }
  0xbf   :  { %1262 = vmatprep.subr.bf16.mxu1 %v1261_v38 }
  0xc2   :  { %1264 = vmatpush1.bf16.msra.mxu1 %v1263_v45  ;;  %v747_v45 = vld [vmem:[#allocation3 + $0x388] sm:$0xff] }
  0xc3   :  { %1266 = vmatprep.subr.bf16.mxu1 %v1265_v50 }
  0xc6   :  { %1268 = vmatpush1.bf16.msra.mxu1 %v1267_v57  ;;  %v751_v57 = vld [vmem:[#allocation3 + $0x3a8] sm:$0xff] }
  0xc7   :  { %1270 = vmatprep.subr.bf16.mxu1 %v1269_v62 }
  0xca   :  { %1272 = vmatpush1.bf16.msra.mxu1 %v1271_v13  ;;  %v755_v13 = vld [vmem:[#allocation3 + $0x3c8] sm:$0xff] }
 0x176   :  { %v1766_v3 = vpop.f32.mrb[0].mxu1 }
 0x177   :  { %521 = vrot.lane.b32.xlu1 %v1766_v3, %s1547_s30  ;;  %v1770_v4 = vpop.f32.mrb[1].mxu1 }
 0x17a   :  { %v1772_v5 = vpop.f32.mrb[2].mxu1 }
 0x17b   :  { %531 = vrot.lane.b32.xlu1 %v1770_v4, %s1547_s30  ;;  %v1776_v6 = vpop.f32.mrb[0].mxu0  ;;  %v1778_v7 = vpop.f32.mrb[3].mxu1 }
 0x17c   :  { %274 = vrot.lane.b32.xlu0 %v1776_v6, %s1547_s30  ;;  %v1782_v8 = vpop.f32.mrb[1].mxu0 }
 0x17f   :  { %284 = vrot.lane.b32.xlu1 %v1782_v8, %s1547_s30  ;;  %v1789_v10 = vpop.f32.mrb[2].mxu0 }
 0x180   :  { %301 = vperm.xlu0 %1481, %v49_v9   ;;  %v1791_v11 = vpop.f32.mrb[3].mxu0  ;;  %v716_v9 = vld [vmem:[#allocation3 + $0x290] sm:$0xff] }
 0x181   :  { %v1319_v20 = vpack.c.bf16 %v716_v9, %v714_v2  ;;  %v671_v2 = vld [vmem:[#allocation3 + $0x128] sm:$0xff]  ;;  %v673_v9 = vld [vmem:[#allocation3 + $0x138] sm:$0xff] }
 0x182   :  { %v1273_v19 = vpack.c.bf16 %v673_v9, %v671_v2  ;;  %v686_v2 = vld [vmem:[#allocation3 + $0x1a0] sm:$0xff]  ;;  %v1289_v9 = vpack.c.bf16 %v689_v60, %v687_v59 }
 0x183   :  { %523 = vrot.lane.b32.xlu1 %v1772_v5, %s1547_s30  ;;  %1320 = vmatpush1.bf16.msra.mxu0 %v1319_v20  ;;  %v672_v20 = vld [vmem:[#allocation3 + $0x130] sm:$0xff] }
 0x184   :  { %533 = vrot.lane.b32.xlu0 %v1778_v7, %s1547_s30  ;;  %1322 = vmatprep.subr.bf16.mxu0 %v1321_v22  ;;  %v741_v22 = vld [vmem:[#allocation3 + $0x358] sm:$0xff]  ;;  %v1275_v26 = vpack.c.bf16 %v672_v20, %v670_v18  ;;  %v1355_v18 = vpack.c.bf16 %v752_v1, %v750_v0 }
 0x185   :  { %v1341_v27 = vpack.c.bf16 %v741_v22, %v739_v21  ;;  %1274 = vmatprep.subr.bf16.mxu1 %v1273_v19  ;;  %v754_v21 = vld [vmem:[#allocation3 + $0x3c0] sm:$0xff]  ;;  %v756_v22 = vld [vmem:[#allocation3 + $0x3d0] sm:$0xff] }
 0x186   :  { %1276 = vmatpush1.bf16.msra.mxu1 %v1275_v26  ;;  %v759_v26 = vld [vmem:[#allocation3 + $0x3e8] sm:$0xff]  ;;  %v1359_v28 = vpack.c.bf16 %v756_v22, %v754_v21 }
 0x187   :  { %276 = vrot.lane.b32.xlu1 %v1789_v10, %s1547_s30  ;;  %1324 = vmatpush1.bf16.msra.mxu0 %v1323_v32  ;;  %v676_v32 = vld [vmem:[#allocation3 + $0x150] sm:$0xff] }
 0x188   :  { %286 = vrot.lane.b32.xlu0 %v1791_v11, %s1547_s30  ;;  %1326 = vmatprep.subr.bf16.mxu0 %v1325_v34  ;;  %v745_v34 = vld [vmem:[#allocation3 + $0x378] sm:$0xff]  ;;  %v1279_v38 = vpack.c.bf16 %v676_v32, %v674_v30  ;;  %v297_v32 = vpop.permute.xlu0 %296 }
 0x189   :  { %v1345_v39 = vpack.c.bf16 %v745_v34, %v743_v33  ;;  %1278 = vmatprep.subr.bf16.mxu1 %v1277_v31 }
 0x18a   :  { %1280 = vmatpush1.bf16.msra.mxu1 %v1279_v38 }
 0x18b   :  { %1328 = vmatpush1.bf16.msra.mxu0 %v1327_v44  ;;  %v680_v44 = vld [vmem:[#allocation3 + $0x170] sm:$0xff]  ;;  %1282 = vmatprep.subr.bf16.mxu1 %v1281_v43 }
 0x18c   :  { %1330 = vmatprep.subr.bf16.mxu0 %v1329_v46  ;;  %v749_v46 = vld [vmem:[#allocation3 + $0x398] sm:$0xff]  ;;  %v1283_v50 = vpack.c.bf16 %v680_v44, %v678_v42 }
 0x18d   :  { %v1349_v51 = vpack.c.bf16 %v749_v46, %v747_v45  ;;  %v695_v45 = vld [vmem:[#allocation3 + $0x1e8] sm:$0xff]  ;;  %v697_v46 = vld [vmem:[#allocation3 + $0x1f8] sm:$0xff] }
 0x18e   :  { %1284 = vmatpush1.bf16.msra.mxu1 %v1283_v50  ;;  %v1297_v48 = vpack.c.bf16 %v697_v46, %v695_v45 }
 0x18f   :  { %1332 = vmatpush1.bf16.msra.mxu0 %v1331_v56  ;;  %v684_v56 = vld [vmem:[#allocation3 + $0x190] sm:$0xff]  ;;  %1286 = vmatprep.subr.bf16.mxu1 %v1285_v55 }
 0x190   :  { %1334 = vmatprep.subr.bf16.mxu0 %v1333_v58  ;;  %v753_v58 = vld [vmem:[#allocation3 + $0x3b8] sm:$0xff]  ;;  %v1287_v62 = vpack.c.bf16 %v684_v56, %v682_v54 }
 0x191   :  { %v1353_v63 = vpack.c.bf16 %v753_v58, %v751_v57 }
 0x192   :  { %1288 = vmatpush1.bf16.msra.mxu1 %v1287_v62 }
 0x193   :  { %1336 = vmatpush1.bf16.msra.mxu0 %v1335_v12  ;;  %v688_v12 = vld [vmem:[#allocation3 + $0x1b0] sm:$0xff]  ;;  %1290 = vmatprep.subr.bf16.mxu1 %v1289_v9 }
 0x194   :  { %1338 = vmatprep.subr.bf16.mxu0 %v1337_v15  ;;  %v757_v15 = vld [vmem:[#allocation3 + $0x3d8] sm:$0xff]  ;;  %v1291_v19 = vpack.c.bf16 %v688_v12, %v686_v2 }
 0x195   :  { %v1357_v20 = vpack.c.bf16 %v757_v15, %v755_v13 }
 0x196   :  { %1292 = vmatpush1.bf16.msra.mxu1 %v1291_v19 }
 0x197   :  { %1340 = vmatpush1.bf16.msra.mxu0 %v1339_v25  ;;  %v692_v25 = vld [vmem:[#allocation3 + $0x1d0] sm:$0xff]  ;;  %1294 = vmatprep.subr.bf16.mxu1 %v1293_v24 }
 0x198   :  { %1342 = vmatprep.subr.bf16.mxu0 %v1341_v27  ;;  %v761_v27 = vld [vmem:[#allocation3 + $0x3f8] sm:$0xff]  ;;  %v1295_v29 = vpack.c.bf16 %v692_v25, %v690_v23 }
 0x199   :  { %v1361_v30 = vpack.c.bf16 %v761_v27, %v759_v26 }
 0x19a   :  { %1296 = vmatpush1.bf16.msra.mxu1 %v1295_v29 }
 0x19b   :  { %1344 = vmatpush1.bf16.msra.mxu0 %v1343_v37  ;;  %1298 = vmatprep.subr.bf16.mxu1 %v1297_v48  ;;  %v769_v48 = vld [vmem:[#allocation3 + $0x438] sm:$0xff] }
 0x19c   :  { %1346 = vmatprep.subr.bf16.mxu0 %v1345_v39 }
 0x19f   :  { %1348 = vmatpush1.bf16.msra.mxu0 %v1347_v49  ;;  %v694_v49 = vld [vmem:[#allocation3 + $0x1e0] sm:$0xff] }
 0x1a0   :  { %1350 = vmatprep.subr.bf16.mxu0 %v1349_v51 }
 0x1a3   :  { %1352 = vmatpush1.bf16.msra.mxu0 %v1351_v61 }
 0x1a4   :  { %1354 = vmatprep.subr.bf16.mxu0 %v1353_v63 }
 0x1a7   :  { %1356 = vmatpush1.bf16.msra.mxu0 %v1355_v18 }
 0x1a8   :  { %1358 = vmatprep.subr.bf16.mxu0 %v1357_v20 }
 0x1ab   :  { %1360 = vmatpush1.bf16.msra.mxu0 %v1359_v28 }
 0x1ac   :  { %1362 = vmatprep.subr.bf16.mxu0 %v1361_v30 }
 0x1e9   :  { %v522_v31 = vpop.permute.xlu1 %521 }
 0x1ea   :  { %v527_v34 = vmax.f32 %v1766_v3, %v522_v31  ;;  %v760_v3 = vld [vmem:[#allocation3 + $0x3f0] sm:$0xff] }
 0x1eb   :  { %v1363_v51 = vpack.c.bf16 %v760_v3, %v758_v47  ;;  %v767_v47 = vld [vmem:[#allocation3 + $0x428] sm:$0xff] }
 0x1ed   :  { %v532_v33 = vpop.permute.xlu1 %531  ;;  %1364 = vmatpush1.bf16.msra.mxu0 %v1363_v51 }
 0x1ee   :  { %v537_v35 = vmax.f32 %v1770_v4, %v532_v33  ;;  %v275_v36 = vpop.permute.xlu0 %274  ;;  %v696_v4 = vld [vmem:[#allocation3 + $0x1f0] sm:$0xff] }
 0x1ef   :  { %v280_v40 = vmax.f32 %v1776_v6, %v275_v36  ;;  %v1299_v52 = vpack.c.bf16 %v696_v4, %v694_v49  ;;  %v763_v6 = vld [vmem:[#allocation3 + $0x408] sm:$0xff] }
 0x1f0   :  { %v539_v37 = vmax.f32 %v527_v34, %v537_v35  ;;  %v762_v35 = vld [vmem:[#allocation3 + $0x400] sm:$0xff] }
 0x1f1   :  { %v285_v38 = vpop.permute.xlu1 %284  ;;  %1300 = vmatpush1.bf16.msra.mxu1 %v1299_v52 }
 0x1f2   :  { %v541_v39 = vadd.f32 %v539_v37, %v297_v32  ;;  %v290_v41 = vmax.f32 %v1782_v8, %v285_v38  ;;  %v765_v8 = vld [vmem:[#allocation3 + $0x418] sm:$0xff]  ;;  %v764_v37 = vld [vmem:[#allocation3 + $0x410] sm:$0xff] }
 0x1f3   :  { %v1365_v53 = vpack.c.bf16 %v765_v8, %v763_v6  ;;  %v1367_v46 = vpack.c.bf16 %v764_v37, %v762_v35  ;;  %v793_v35 = vld [vmem:[#allocation3 + $0x4f8] sm:$0xff]  ;;  %v790_v37 = vld [vmem:[#allocation3 + $0x4e0] sm:$0xff] }
 0x1f4   :  { %v543_v42 = vmax.f32 %v541_v39, 0.0  ;;  %v292_v43 = vmax.f32 %v280_v40, %v290_v41 }
 0x1f5   :  { %1366 = vmatprep.subr.bf16.mxu0 %v1365_v53  ;;  %v524_v58 = vpop.permute.xlu1 %523 }
 0x1f6   :  { %546 = vst.msk [vmem:[#allocation2 + $0x10] sm:$0xff] %vm74_vm0, %v543_v42  ;;  %v304_v44 = vadd.f32 %v297_v32, %v292_v43  ;;  %v528_v19 = vmax.f32 %v1772_v5, %v524_v58  ;;  %v766_v58 = vld [vmem:[#allocation3 + $0x420] sm:$0xff] }
 0x1f8   :  { %v306_v50 = vmax.f32 %v304_v44, 0.0 }
 0x1f9   :  { %v277_v22 = vpop.permute.xlu1 %276 }
 0x1fa   :  { %308 = vst.msk [vmem:[#allocation2] sm:$0xff] %vm74_vm0, %v306_v50  ;;  %v281_v25 = vmax.f32 %v1789_v10, %v277_v22 }
 0x1fd   :  { %v559_v54 = vld [vmem:[#allocation2 + $0x15] sm:$0x1]  ;;  %v563_v55 = vld [vmem:[#allocation2 + $0x17] sm:$0x1]  ;;  %v551_v56 = vld [vmem:[#allocation2 + $0x11] sm:$0x1] }
 0x1fe   :  { %v555_v57 = vld [vmem:[#allocation2 + $0x13] sm:$0x1]  ;;  %v600_v60 = vrot.slane %v559_v54, 7  ;;  %v612_v61 = vrot.slane %v563_v55, 7  ;;  %v576_v62 = vrot.slane %v551_v56, 7 }
 0x1ff   :  { %v302_v59 = vpop.permute.xlu0 %301  ;;  %v588_v63 = vrot.slane %v555_v57, 7  ;;  %v553_v34 = vld [vmem:[#allocation2 + $0x12] sm:$0x1]  ;;  %v561_v10 = vld [vmem:[#allocation2 + $0x16] sm:$0x1]  ;;  %v1369_v57 = vpack.c.bf16 %v769_v48, %v767_v47  ;;  %v1021_v47 = vld [vmem:[%s1950_s6] sm:$0xff] }
 0x200   :  { %v557_v36 = vld [vmem:[#allocation2 + $0x14] sm:$0x1]  ;;  %v549_v38 = vld [vmem:[#allocation2 + $0x10] sm:$0x1]  ;;  %v583_v39 = vrot.slane %v553_v34, 7  ;;  %v607_v43 = vrot.slane %v561_v10, 7 }
 0x201   :  { %v558_v0 = vld [vmem:[#allocation2 + $0x5] sm:$0x1]  ;;  %v562_v1 = vld [vmem:[#allocation2 + $0x7] sm:$0x1]  ;;  %v550_v2 = vld [vmem:[#allocation2 + $0x1] sm:$0x1] }
 0x202   :  { %v601_v9 = vsel %vm571_vm3, %v600_v60, %v558_v0  ;;  %v613_v12 = vsel %vm571_vm3, %v612_v61, %v562_v1  ;;  %v554_v13 = vld [vmem:[#allocation2 + $0x3] sm:$0x1]  ;;  %v577_v15 = vsel %vm571_vm3, %v576_v62, %v550_v2  ;;  %v560_v40 = vld [vmem:[#allocation2 + $0x6] sm:$0x1]  ;;  %v556_v41 = vld [vmem:[#allocation2 + $0x4] sm:$0x1] }
 0x203   :  { %v534_v16 = vpop.permute.xlu0 %533  ;;  %v1482_v17 = vpack.i.bf16 %v601_v9, %v613_v12  ;;  %v589_v18 = vsel %vm571_vm3, %v588_v63, %v554_v13  ;;  %v548_v44 = vld [vmem:[#allocation2] sm:$0x1]  ;;  %v595_v45 = vrot.slane %v557_v36, 7  ;;  %v570_v51 = vrot.slane %v549_v38, 7  ;;  %v771_v62 = vld [vmem:[#allocation3 + $0x448] sm:$0xff]  ;;  %v773_v63 = vld [vmem:[#allocation3 + $0x458] sm:$0xff] }
 0x204   :  { %v538_v20 = vmax.f32 %v1778_v7, %v534_v16  ;;  %v1487_v21 = vpack.i.bf16 %v577_v15, %v589_v18  ;;  %v608_v8 = vsel %vm571_vm3, %v607_v43, %v560_v40  ;;  %v1373_v1 = vpack.c.bf16 %v773_v63, %v771_v62  ;;  %v770_v2 = vld [vmem:[#allocation3 + $0x440] sm:$0xff]  ;;  %v772_v9 = vld [vmem:[#allocation3 + $0x450] sm:$0xff]  ;;  %v775_v12 = vld [vmem:[#allocation3 + $0x468] sm:$0xff] }
 0x205   :  { %1483 = vrot.lane.b32.xlu1 %v1482_v17, %s1547_s30  ;;  %v596_v53 = vsel %vm571_vm3, %v595_v45, %v556_v41  ;;  %v572_v55 = vsel %vm571_vm3, %v570_v51, %v548_v44  ;;  %v777_v13 = vld [vmem:[#allocation3 + $0x478] sm:$0xff]  ;;  %v1375_v15 = vpack.c.bf16 %v772_v9, %v770_v2  ;;  %v774_v17 = vld [vmem:[#allocation3 + $0x460] sm:$0xff]  ;;  %v776_v18 = vld [vmem:[#allocation3 + $0x470] sm:$0xff] }
 0x206   :  { %v540_v23 = vmax.f32 %v528_v19, %v538_v20  ;;  %1488 = vrot.lane.b32.xlu0 %v1487_v21, %s1547_s30  ;;  %v1377_v16 = vpack.c.bf16 %v777_v13, %v775_v12  ;;  %v779_v19 = vld [vmem:[#allocation3 + $0x488] sm:$0xff]  ;;  %v781_v20 = vld [vmem:[#allocation3 + $0x498] sm:$0xff]  ;;  %v1379_v21 = vpack.c.bf16 %v776_v18, %v774_v17  ;;  %v1037_v45 = vld [vmem:[%s1950_s6 + $0x80] sm:$0xff] }
 0x207   :  { %v287_v24 = vpop.permute.xlu0 %286  ;;  %v1381_v22 = vpack.c.bf16 %v781_v20, %v779_v19  ;;  %v791_v34 = vld [vmem:[#allocation3 + $0x4e8] sm:$0xff]  ;;  %v1027_v62 = vld [vmem:[%s1950_s6 + $0x30] sm:$0xff]  ;;  %v1028_v63 = vld [vmem:[%s1950_s6 + $0x38] sm:$0xff] }
 0x208   :  { %v542_v26 = vadd.f32 %v540_v23, %v302_v59  ;;  %v291_v27 = vmax.f32 %v1791_v11, %v287_v24  ;;  %v552_v11 = vld [vmem:[#allocation2 + $0x2] sm:$0x1]  ;;  %v780_v24 = vld [vmem:[#allocation3 + $0x490] sm:$0xff]  ;;  %v1393_v36 = vpack.c.bf16 %v793_v35, %v791_v34  ;;  %v1411_v2 = vpack.c.bf16 %v1028_v63, %v1027_v62  ;;  %v1030_v13 = vld [vmem:[%s1950_s6 + $0x48] sm:$0xff] }
 0x209   :  { %v584_v50 = vsel %vm571_vm3, %v583_v39, %v552_v11  ;;  %v778_v23 = vld [vmem:[#allocation3 + $0x480] sm:$0xff]  ;;  %v792_v11 = vld [vmem:[#allocation3 + $0x4f0] sm:$0xff]  ;;  %v1032_v20 = vld [vmem:[%s1950_s6 + $0x58] sm:$0xff] }
 0x20a   :  { %v544_v28 = vmax.f32 %v542_v26, 0.0  ;;  %v293_v29 = vmax.f32 %v281_v25, %v291_v27  ;;  %v783_v25 = vld [vmem:[#allocation3 + $0x4a8] sm:$0xff]  ;;  %v785_v26 = vld [vmem:[#allocation3 + $0x4b8] sm:$0xff]  ;;  %v1395_v39 = vpack.c.bf16 %v792_v11, %v790_v37  ;;  %v1029_v12 = vld [vmem:[%s1950_s6 + $0x40] sm:$0xff] }
 0x20b   :  { %v1385_v27 = vpack.c.bf16 %v785_v26, %v783_v25  ;;  %v1415_v17 = vpack.c.bf16 %v1030_v13, %v1029_v12  ;;  %v1031_v19 = vld [vmem:[%s1950_s6 + $0x50] sm:$0xff]  ;;  %v1033_v25 = vld [vmem:[%s1950_s6 + $0x60] sm:$0xff]  ;;  %v1034_v26 = vld [vmem:[%s1950_s6 + $0x68] sm:$0xff] }
 0x20c   :  { %547 = vst.msk [vmem:[#allocation2 + $0x18] sm:$0x3] %vm309_vm4, %v544_v28  ;;  %v305_v5 = vadd.f32 %v302_v59, %v293_v29  ;;  %v768_v59 = vld [vmem:[#allocation3 + $0x430] sm:$0xff]  ;;  %v782_v28 = vld [vmem:[#allocation3 + $0x4a0] sm:$0xff] }
 0x20d   :  { %v1371_v0 = vpack.c.bf16 %v768_v59, %v766_v58  ;;  %v784_v29 = vld [vmem:[#allocation3 + $0x4b0] sm:$0xff]  ;;  %v1044_v59 = vld [vmem:[%s1950_s6 + $0xb8] sm:$0xff] }
 0x20e   :  { %v307_v30 = vmax.f32 %v305_v5, 0.0  ;;  %v787_v5 = vld [vmem:[#allocation3 + $0x4c8] sm:$0xff]  ;;  %v1043_v58 = vld [vmem:[%s1950_s6 + $0xb0] sm:$0xff] }
 0x210   :  { %310 = vst.msk [vmem:[#allocation2 + $0x8] sm:$0x3] %vm309_vm4, %v307_v30  ;;  %v789_v30 = vld [vmem:[#allocation3 + $0x4d8] sm:$0xff] }
 0x213   :  { %v567_v7 = vld [vmem:[#allocation2 + $0x19] sm:$0x1]  ;;  %v565_v38 = vld [vmem:[#allocation2 + $0x18] sm:$0x1] }
 0x214   :  { %v624_v31 = vrot.slane %v567_v7, 7  ;;  %v1387_v7 = vpack.c.bf16 %v784_v29, %v782_v28  ;;  %v619_v41 = vrot.slane %v565_v38, 7  ;;  %v1052_v28 = vld [vmem:[%s1950_s6 + $0xf8] sm:$0xff]  ;;  %v1035_v29 = vld [vmem:[%s1950_s6 + $0x70] sm:$0xff] }
 0x217   :  { %v566_v32 = vld [vmem:[#allocation2 + $0x9] sm:$0x1]  ;;  %v564_v40 = vld [vmem:[#allocation2 + $0x8] sm:$0x1] }
 0x218   :  { %v625_v33 = vsel %vm571_vm3, %v624_v31, %v566_v32  ;;  %v1389_v31 = vpack.c.bf16 %v789_v30, %v787_v5  ;;  %v786_v32 = vld [vmem:[#allocation3 + $0x4c0] sm:$0xff]  ;;  %v620_v43 = vsel %vm571_vm3, %v619_v41, %v564_v40  ;;  %v1036_v30 = vld [vmem:[%s1950_s6 + $0x78] sm:$0xff] }
 0x219   :  { %626 = vrot.lane.b32.xlu1 %v625_v33, %s1547_s30  ;;  %v788_v33 = vld [vmem:[#allocation3 + $0x4d0] sm:$0xff] }
 0x21a   :  { %v1391_v10 = vpack.c.bf16 %v788_v33, %v786_v32  ;;  %v796_v33 = vlaneseq }
 0x21c   :  { %v797_v34 = vshrl.u32 %v796_v33, 7 }
 0x21e   :  { %v798_v35 = vsub.s32 0, %v797_v34 }
 0x277   :  { %v1484_v42 = vpop.permute.xlu1 %1483 }
 0x278   :  { %v1486_v3 = vunpack.i.h.bf16 %v1484_v42  ;;  %v1485_v49 = vunpack.i.l.bf16 %v1484_v42  ;;  %v1489_v4 = vpop.permute.xlu0 %1488 }
 0x279   :  { %v1491_v52 = vunpack.i.h.bf16 %v1489_v4  ;;  %v1490_v6 = vunpack.i.l.bf16 %v1489_v4  ;;  %v1040_v4 = vld [vmem:[%s1950_s6 + $0x98] sm:$0xff] }
 0x27a   :  { %v632_v54 = vsel %vm74_vm0, %v608_v8, %v1485_v49  ;;  %v631_v56 = vsel %vm74_vm0, %v596_v53, %v1486_v3  ;;  %v1022_v3 = vld [vmem:[%s1950_s6 + $0x8] sm:$0xff]  ;;  %v1039_v49 = vld [vmem:[%s1950_s6 + $0x90] sm:$0xff]  ;;  %v1041_v8 = vld [vmem:[%s1950_s6 + $0xa0] sm:$0xff] }
 0x27b   :  { %v630_v60 = vsel %vm74_vm0, %v584_v50, %v1490_v6  ;;  %941 = vmatprep.mubr.f32.mxu0 %v632_v54  ;;  %v629_v61 = vsel %vm74_vm0, %v572_v55, %v1491_v52  ;;  %v1399_v50 = vpack.c.bf16 %v1022_v3, %v1021_v47  ;;  %v1401_v51 = vpack.c.bf16 %v1040_v4, %v1039_v49  ;;  %v1023_v52 = vld [vmem:[%s1950_s6 + $0x10] sm:$0xff]  ;;  %v1024_v6 = vld [vmem:[%s1950_s6 + $0x18] sm:$0xff]  ;;  %v1042_v53 = vld [vmem:[%s1950_s6 + $0xa8] sm:$0xff] }
 0x27c   :  { %870 = vmatprep.mubr.f32.mxu1 %v630_v60  ;;  %942 = vmatmul.mubr.f32.vlgmr.msra.gmra.mrb[4].mxu0 %v631_v56  ;;  %v1403_v54 = vpack.c.bf16 %v1024_v6, %v1023_v52  ;;  %v1405_v55 = vpack.c.bf16 %v1042_v53, %v1041_v8  ;;  %v1025_v56 = vld [vmem:[%s1950_s6 + $0x20] sm:$0xff]  ;;  %v1132_v3 = vand.u32 127, %v796_v33 }
 0x27d   :  { %871 = vmatmul.mubr.f32.vlgmr.msra.gmra.mrb[4].mxu1 %v629_v61  ;;  %1368 = vmatpush1.bf16.msra.mxu0 %v1367_v46  ;;  %v1038_v46 = vld [vmem:[%s1950_s6 + $0x88] sm:$0xff]  ;;  %v1409_v61 = vpack.c.bf16 %v1044_v59, %v1043_v58  ;;  %v1185_v47 = vld [vmem:[%s1951_s7] ss:$0 sm:$0xff] }
 0x27e   :  { %1370 = vmatprep.subr.bf16.mxu0 %v1369_v57  ;;  %1012 = vmatprep.mubr.f32.mxu0 %v1549_v14  ;;  %v1383_v14 = vpack.c.bf16 %v780_v24, %v778_v23  ;;  %v1397_v48 = vpack.c.bf16 %v1038_v46, %v1037_v45  ;;  %v1026_v57 = vld [vmem:[%s1950_s6 + $0x28] sm:$0xff]  ;;  %v1419_v23 = vpack.c.bf16 %v1032_v20, %v1031_v19  ;;  %vm1133_vm5 = vcmp.lt.s32.totalorder %v1132_v3, 4 }
 0x27f   :  { %v1407_v60 = vpack.c.bf16 %v1026_v57, %v1025_v56 }
 0x280   :  { %1398 = vmatprep.subr.bf16.mxu1 %v1397_v48 }
 0x281   :  { %1372 = vmatpush1.bf16.msra.mxu0 %v1371_v0  ;;  %1400 = vmatpush3.bf16.msra.mxu1 %v1399_v50  ;;  %v1045_v0 = vld [vmem:[%s1950_s6 + $0xc0] sm:$0xff] }
 0x282   :  { %1374 = vmatprep.subr.bf16.mxu0 %v1373_v1  ;;  %1402 = vmatprep.subr.bf16.mxu1 %v1401_v51  ;;  %v1046_v1 = vld [vmem:[%s1950_s6 + $0xc8] sm:$0xff] }
 0x283   :  { %v1413_v9 = vpack.c.bf16 %v1046_v1, %v1045_v0 }
 0x285   :  { %1376 = vmatpush1.bf16.msra.mxu0 %v1375_v15  ;;  %1404 = vmatpush3.bf16.msra.mxu1 %v1403_v54  ;;  %v1047_v15 = vld [vmem:[%s1950_s6 + $0xd0] sm:$0xff] }
 0x286   :  { %1378 = vmatprep.subr.bf16.mxu0 %v1377_v16  ;;  %1406 = vmatprep.subr.bf16.mxu1 %v1405_v55  ;;  %v1048_v16 = vld [vmem:[%s1950_s6 + $0xd8] sm:$0xff] }
 0x287   :  { %v1417_v18 = vpack.c.bf16 %v1048_v16, %v1047_v15 }
 0x289   :  { %1380 = vmatpush1.bf16.msra.mxu0 %v1379_v21  ;;  %1408 = vmatpush3.bf16.msra.mxu1 %v1407_v60  ;;  %v1049_v21 = vld [vmem:[%s1950_s6 + $0xe0] sm:$0xff] }
 0x28a   :  { %1382 = vmatprep.subr.bf16.mxu0 %v1381_v22  ;;  %1410 = vmatprep.subr.bf16.mxu1 %v1409_v61  ;;  %v1050_v22 = vld [vmem:[%s1950_s6 + $0xe8] sm:$0xff] }
 0x28b   :  { %v627_v42 = vpop.permute.xlu1 %626  ;;  %v1421_v24 = vpack.c.bf16 %v1050_v22, %v1049_v21 }
 0x28c   :  { %v633_v44 = vsel %vm74_vm0, %v620_v43, %v627_v42 }
 0x28d   :  { %1384 = vmatpush1.bf16.msra.mxu0 %v1383_v14  ;;  %1412 = vmatpush3.bf16.msra.mxu1 %v1411_v2  ;;  %v1423_v14 = vpack.c.bf16 %v1034_v26, %v1033_v25 }
 0x28e   :  { %1386 = vmatprep.subr.bf16.mxu0 %v1385_v27  ;;  %1414 = vmatprep.subr.bf16.mxu1 %v1413_v9  ;;  %v1051_v27 = vld [vmem:[%s1950_s6 + $0xf0] sm:$0xff] }
 0x28f   :  { %v1425_v5 = vpack.c.bf16 %v1052_v28, %v1051_v27 }
 0x291   :  { %1388 = vmatpush1.bf16.msra.mxu0 %v1387_v7  ;;  %1416 = vmatpush3.bf16.msra.mxu1 %v1415_v17  ;;  %v1427_v7 = vpack.c.bf16 %v1036_v30, %v1035_v29 }
 0x292   :  { %1390 = vmatprep.subr.bf16.mxu0 %v1389_v31  ;;  %1418 = vmatprep.subr.bf16.mxu1 %v1417_v18 }
 0x295   :  { %1392 = vmatpush1.bf16.msra.mxu0 %v1391_v10  ;;  %1420 = vmatpush3.bf16.msra.mxu1 %v1419_v23  ;;  %v794_v10 = vld [vmem:[%s1949_s5] sm:$0x3]  ;;  %s1551_s5 = smov [#allocation6]  }
 0x296   :  { %1394 = vmatprep.subr.bf16.mxu0 %v1393_v36  ;;  %1422 = vmatprep.subr.bf16.mxu1 %v1421_v24  ;;  %v802_v36 = vsub.s32 1, %v797_v34  ;;  %v799_v37 = vrot.slane %v794_v10, %v798_v35  ;;  %s1154_s7 = sshll.u32 %s1551_s5, 4  ;;  %s1155_s7 = int_to_ptr.vmem [resolvable:$true] %s1154_s7 }
 0x297   :  { %s1518_s20 = scalar_lea.vmem %s1155_s7, 32  ;;  %p1523_p9 = scmp.lt.s32.totalorder %s1155_s7, %s1155_s7 }
 0x298   :  { %v803_v11 = vrot.slane %v794_v10, %v802_v36  ;;  %p1519_p8 = scmp.ne.s32.totalorder %s1155_s7, %s1518_s20  ;;  %p1524_p10 = scmp.lt.s32.totalorder %s1518_s20, %s1518_s20 }
 0x299   :  { %1396 = vmatpush1.bf16.msra.mxu0 %v1395_v39  ;;  %1424 = vmatpush3.bf16.msra.mxu1 %v1423_v14 }
 0x29a   :  { %1426 = vmatprep.subr.bf16.mxu1 %v1425_v5  ;;  %p1525_p11 = por %p1524_p10, %p1523_p9 }
 0x29c   :  { %1013 = vmatmul.mubr.f32.vlgmr.msra.gmra.mrb[4].mxu0 %v633_v44  ;;  %p1526_p12 = pnand %p1525_p11, %p1519_p8 }
 0x29d   :  { %1428 = vmatpush3.bf16.msra.mxu1 %v1427_v7 }
 0x350   :  { %v872_v31 = vpop.f32.mrb[4].mxu1 }
 0x351   :  { %v874_v32 = vpop.f32.mrb[5].mxu1  ;;  %v873_v38 = vadd.f32 %v872_v31, %v799_v37 }
 0x352   :  { %v875_v39 = vadd.f32 %v874_v32, %v803_v11 }
 0x36f   :  { %v1014_v40 = vpop.f32.mrb[4].mxu0 }
 0x370   :  { %v1430_v41 = vadd.f32 %v1014_v40, %v873_v38  ;;  %v1016_v42 = vpop.f32.mrb[5].mxu0 }
 0x371   :  { %v1432_v43 = vadd.f32 %v1016_v42, %v875_v39 }
 0x372   :  { %v1019_v45 = vmax.f32 %v1430_v41, 0.0 }
 0x373   :  { %v1020_v44 = vmax.f32 %v1432_v43, 0.0 }
 0x375   :  { %1124 = vmatprep.mubr.f32.mxu1 %v1020_v44 }
 0x376   :  { %1125 = vmatmul.mubr.f32.vlgmr.msra.gmra.mrb[6].mxu1 %v1019_v45 }
 0x449   :  { %v1218_v46 = vpop.f32.mrb[6].mxu1 }
 0x44a   :  { %v1219_v48 = vpop.f32.mrb[7].mxu1 }
 0x44b   :  { %v1220_v49 = vadd.f32 %v1219_v48, %v1218_v46 }
 0x44d   :  { %v1127_v4 = vadd.f32 %v1220_v49, %v1185_v47 }
 0x44f   :  { %v1130_v50 = vmax.f32 %v1127_v4, 0.0 }
 0x451   :  { %v1134_v51 = vsel %vm1133_vm5, %v1130_v50, -1e+30 }
 0x452   :  { %v1136_v52 = vsel %vm1135_vm6, %v1134_v51, -inf }
 0x453   :  { %1137 = vmax.xlane.f32.xlu0 %v1136_v52 }
 0x4e0   :  { %v1138_v6 = vpop.xlane.xlu0 %1137 }
 0x4e1   :  { %v1139_v8 = vsub.f32 %v1134_v51, %v1138_v6 }
 0x4e3   :  { %v1140_v53 = vmul.f32 1.442695, %v1139_v8 }
 0x4e5   :  { %1492 = vpow2.f32 %v1140_v53 }
 0x4ef   :  { %v1493_v54 = vpop.eup %1492 }
 0x4f0   :  { %v1142_v55 = vsel %vm1135_vm6, %v1493_v54, 0.0 }
 0x4f1   :  { %1143 = vadd.xlane.f32.xlu1 %v1142_v55 }
 0x57e   :  { %v1144_v56 = vpop.xlane.xlu1 %1143 }
 0x57f   :  { %1494 = vrcp.f32 %v1144_v56 }
 0x589   :  { %v1495_v57 = vpop.eup %1494 }
 0x58a   :  { %v1146_v58 = vmul.f32 %v1495_v57, %v1493_v54 }
 0x58c   :  { %1147 = vst [vmem:[#allocation6] sm:$0x3] %v1146_v58 }
 0x58d   :  { %1529 = shalt.err (!%p1526_p12)
}
 0x58e   :  { %s1530_s23 = scalar_lea.hbm %s1952_s8, 32 }
 0x58f   :  { %p1531_p13 = scmp.ne.s32.totalorder %s1952_s8, %s1530_s23  ;;  %p1534_p0 = scmp.lt.u32.totalorder %s1530_s23, %s1952_s8 }
 0x591   :  { %p1536_p1 = pnand %p1534_p0, %p1531_p13 }
 0x593   :  { %1539 = shalt.err (!%p1536_p1)
}
 0x594   :  { %1157 = dma.vmem_to_hbm [thread:$0]  %s1155_s7, 32, %s1952_s8, [#allocation5]  }
 0x595   :  { %1542 = dma.done.wait [#allocation5], 32  }
 0x596   :  { %1543 = vsyncadd [#allocation5], 4294967264 }
 0x597   :  { %1161 = vsyncpa [#allocation4], 1 }
 0x598   :  { %1162 = vsyncpa [#allocation5], 1 }

</bundles_post_ra>
